<compile_context>
chip_gen: v6e
topology: v6e:2x2x1
jax: 0.10.0
libtpu: 0.0.40
codegen_flags: <defaults>
</compile_context>

<pallas_src>
import math
import jax
import jax.numpy as jnp
from jax import lax
from jax.experimental import pallas as pl
from jax.experimental.pallas import tpu as pltpu

D_MODEL = 32
D_FF = 64
N_HEAD = 4
N_LAYERS = 2
D_HEAD = D_MODEL // N_HEAD
LN_EPS = 1e-6        # final Encoder LN uses eps=1e-6 per spec; layer LNs follow the
                     # standard transformer convention (also 1e-6).
NEG_INF = -1e9


def _layer_norm(x, g, b):
    mu = jnp.mean(x, axis=-1, keepdims=True)
    var = jnp.mean((x - mu) ** 2, axis=-1, keepdims=True)
    return (x - mu) * lax.rsqrt(var + LN_EPS) * g + b


def encoder_kernel(lens_ref, x_ref, wqkv_ref, wo_ref, w1_ref, w2_ref, vec_ref, out_ref):
    # One grid step == one batch element.
    T, D = x_ref.shape[1], x_ref.shape[2]
    F = w1_ref.shape[2]
    L = wqkv_ref.shape[0]
    H = N_HEAD
    dk = D // H

    b = pl.program_id(0)
    seq_len = lens_ref[b]                                   # SMEM scalar (prefetched)

    # Key-padding additive mask for this batch element, built in-kernel.
    col = lax.broadcasted_iota(jnp.int32, (T, T), 1)
    add_mask = jnp.where(col < seq_len, 0.0, NEG_INF).astype(jnp.float32)

    x = x_ref[0]                                            # [T, D] f32 (PE already added)

    for l in range(L):                                      # static layer loop
        # packed per-layer vectors (see pack_small_params for the layout)
        bqkv = vec_ref[l, 0:1, 0:3 * D]                     # [1, 3D]  (bq already scaled)
        bo = vec_ref[l, 0:1, 3 * D:4 * D]                   # [1, D]
        ln1g = vec_ref[l, 1:2, 0:D]
        ln1b = vec_ref[l, 1:2, D:2 * D]
        ln2g = vec_ref[l, 1:2, 2 * D:3 * D]
        ln2b = vec_ref[l, 1:2, 3 * D:4 * D]
        b1 = vec_ref[l, 2:3, 0:F]
        b2 = vec_ref[l, 2:3, F:F + D]

        # ---- fused QKV projection: one [T,D] @ [D,3D] MXU push (bf16 in, f32 acc) ----
        qkv = jnp.dot(x.astype(jnp.bfloat16), wqkv_ref[l],
                      preferred_element_type=jnp.float32) + bqkv          # [T, 3D] f32

        # ---- per-head attention with the output projection folded into the loop ----
        attn_out = jnp.zeros((T, D), jnp.float32)
        for h in range(H):
            qh = qkv[:, 0 * D + h * dk: 0 * D + (h + 1) * dk]             # [T, dk]
            kh = qkv[:, 1 * D + h * dk: 1 * D + (h + 1) * dk]
            vh = qkv[:, 2 * D + h * dk: 2 * D + (h + 1) * dk]
            s = lax.dot_general(qh.astype(jnp.bfloat16), kh.astype(jnp.bfloat16),
                                (((1,), (1,)), ((), ())),
                                preferred_element_type=jnp.float32) + add_mask   # [T, T]
            s = s - jnp.max(s, axis=-1, keepdims=True)
            p = jnp.exp(s)
            p = p / jnp.sum(p, axis=-1, keepdims=True)                    # exact softmax
            ctx_h = jnp.dot(p.astype(jnp.bfloat16), vh.astype(jnp.bfloat16),
                            preferred_element_type=jnp.float32)           # [T, dk]
            # Wo row-slice is sublane-aligned (dk rows); no lane concat needed.
            attn_out = attn_out + jnp.dot(ctx_h.astype(jnp.bfloat16),
                                          wo_ref[l, h * dk:(h + 1) * dk, :],
                                          preferred_element_type=jnp.float32)
        attn_out = attn_out + bo

        # ---- residual + LayerNorm ----
        x = _layer_norm(x + attn_out, ln1g, ln1b)

        # ---- position-wise feed forward (ReLU) + residual + LayerNorm ----
        hid = jnp.maximum(
            jnp.dot(x.astype(jnp.bfloat16), w1_ref[l],
                    preferred_element_type=jnp.float32) + b1, 0.0)
        ffn = jnp.dot(hid.astype(jnp.bfloat16), w2_ref[l],
                      preferred_element_type=jnp.float32) + b2
        x = _layer_norm(x + ffn, ln2g, ln2b)

    # ---- final LayerNorm of the Encoder (params packed in slot L of vec_ref) ----
    fing = vec_ref[L, 0:1, 0:D]
    finb = vec_ref[L, 0:1, D:2 * D]
    out_ref[0] = _layer_norm(x, fing, finb).astype(out_ref.dtype)


def positional_encoding(seq_len, d_model):
    pos = jnp.arange(seq_len, dtype=jnp.float32)[:, None]
    i = jnp.arange(0, d_model, 2, dtype=jnp.float32)[None, :]
    div = jnp.exp(-jnp.log(10000.0) * i / d_model)
    ang = pos * div
    pe = jnp.zeros((seq_len, d_model), jnp.float32)
    pe = pe.at[:, 0::2].set(jnp.sin(ang))
    pe = pe.at[:, 1::2].set(jnp.cos(ang))
    return pe


def make_params(key):
    L, D, F = N_LAYERS, D_MODEL, D_FF
    ks = jax.random.split(key, 6)
    init = lambda k, shape, s=0.02: (s * jax.random.normal(k, shape)).astype(jnp.float32)
    return dict(
        # fused QKV weights: [Wq | Wk | Wv] along the output-feature (lane) axis
        wqkv=init(ks[0], (L, D, 3 * D)), bqkv=init(ks[1], (L, 3 * D), 0.01),
        # output projection (rows are head-major, matching the per-head ctx order)
        wo=init(ks[2], (L, D, D)), bo=init(ks[3], (L, D), 0.01),
        ln1g=jnp.ones((L, D), jnp.float32), ln1b=jnp.zeros((L, D), jnp.float32),
        w1=init(ks[4], (L, D, F)), b1=jnp.zeros((L, F), jnp.float32),
        w2=init(ks[5], (L, F, D)), b2=jnp.zeros((L, D), jnp.float32),
        ln2g=jnp.ones((L, D), jnp.float32), ln2b=jnp.zeros((L, D), jnp.float32),
        fing=jnp.ones((D,), jnp.float32), finb=jnp.zeros((D,), jnp.float32),
    )


def pack_small_params(params, scale):
    """Pack all tiny per-layer vectors + final LN params into one [L+1, 8, 128] f32 array."""
    L, D, F = N_LAYERS, D_MODEL, D_FF
    assert 4 * D <= 128 and F + D <= 128
    vecs = jnp.zeros((L + 1, 8, 128), jnp.float32)
    bqkv = params["bqkv"].at[:, :D].multiply(scale)         # fold 1/sqrt(dk) into bq
    vecs = vecs.at[:L, 0, 0:3 * D].set(bqkv)
    vecs = vecs.at[:L, 0, 3 * D:4 * D].set(params["bo"])
    vecs = vecs.at[:L, 1, 0:D].set(params["ln1g"])
    vecs = vecs.at[:L, 1, D:2 * D].set(params["ln1b"])
    vecs = vecs.at[:L, 1, 2 * D:3 * D].set(params["ln2g"])
    vecs = vecs.at[:L, 1, 3 * D:4 * D].set(params["ln2b"])
    vecs = vecs.at[:L, 2, 0:F].set(params["b1"])
    vecs = vecs.at[:L, 2, F:F + D].set(params["b2"])
    vecs = vecs.at[L, 0, 0:D].set(params["fing"])
    vecs = vecs.at[L, 0, D:2 * D].set(params["finb"])
    return vecs


def encoder_forward(signal, signal_lengths, enc_input, params):
    padding, kernel_size, stride, dilation = 1, 3, 2, 1

    # Length bookkeeping (two conv-subsampling formulas + .int() truncation).
    max_len = signal.shape[1]
    max_len = int((max_len + 2 * padding - dilation * (kernel_size - 1) - 1) / stride + 1)
    max_len = int((max_len + 2 * padding - dilation * (kernel_size - 1) - 1) / stride + 1)
    nl = (signal_lengths + 2 * padding - dilation * (kernel_size - 1) - 1) / stride + 1
    new_lengths = nl.astype(jnp.int32)
    nl = (new_lengths + 2 * padding - dilation * (kernel_size - 1) - 1) / stride + 1
    new_lengths = nl.astype(jnp.int32)

    B = enc_input.shape[0]
    T = max_len
    D, F, L = D_MODEL, D_FF, N_LAYERS
    assert enc_input.shape == (B, T, D)

    # Positional encoding (dropout is identity at inference); keep [B, T, D].
    x = enc_input.astype(jnp.float32) + positional_encoding(T, D)[None]

    # One-time parameter prep: fold the 1/sqrt(dk) scale into Wq/bq, cast matmul
    # weights to bf16 (MXU operands), pack the small vectors into one array.
    scale = 1.0 / math.sqrt(D_HEAD)
    wqkv = params["wqkv"].at[:, :, :D].multiply(scale).astype(jnp.bfloat16)
    wo = params["wo"].astype(jnp.bfloat16)
    w1 = params["w1"].astype(jnp.bfloat16)
    w2 = params["w2"].astype(jnp.bfloat16)
    vecs = pack_small_params(params, scale)

    grid_spec = pltpu.PrefetchScalarGridSpec(
        num_scalar_prefetch=1,                 # new_lengths -> SMEM, read inside kernel
        grid=(B,),
        in_specs=[
            pl.BlockSpec((1, T, D), lambda b, lens: (b, 0, 0)),        # x (per-batch block)
            pl.BlockSpec((L, D, 3 * D), lambda b, lens: (0, 0, 0)),    # wqkv (VMEM-resident)
            pl.BlockSpec((L, D, D), lambda b, lens: (0, 0, 0)),        # wo
            pl.BlockSpec((L, D, F), lambda b, lens: (0, 0, 0)),        # w1
            pl.BlockSpec((L, F, D), lambda b, lens: (0, 0, 0)),        # w2
            pl.BlockSpec((L + 1, 8, 128), lambda b, lens: (0, 0, 0)),  # packed vectors
        ],
        out_specs=pl.BlockSpec((1, T, D), lambda b, lens: (b, 0, 0)),
    )

    enc_out = pl.pallas_call(
        encoder_kernel,
        out_shape=jax.ShapeDtypeStruct((B, T, D), jnp.float32),
        grid_spec=grid_spec,
        compiler_params=pltpu.CompilerParams(
            dimension_semantics=("parallel",)),   # batch axis sharded across TCs on v7x
    )(new_lengths, x, wqkv, wo, w1, w2, vecs)

    return enc_out, new_lengths


if __name__ == "__main__":
    key = jax.random.PRNGKey(0)
    k_sig, k_enc, k_par = jax.random.split(key, 3)

    B, L_SIG = 2, 32                       # two stride-2 subsamplings: 32 -> 16 -> 8
    T = 8
    signal = jax.random.normal(k_sig, (B, L_SIG, 1), jnp.float32)
    signal_lengths = jnp.array([32, 20], jnp.int32)
    enc_input = jax.random.normal(k_enc, (B, T, D_MODEL), jnp.float32)
    params = make_params(k_par)

    enc_out, new_lens = encoder_forward(signal, signal_lengths, enc_input, params)
    jax.block_until_ready(enc_out)
    jax.block_until_ready(new_lens)
    assert enc_out.shape == (B, T, D_MODEL)
    assert new_lens.shape == (B,)
    print("KERNEL_OK")
</pallas_src>

<mosaic_0001>
module attributes {stable_mosaic.version = 11 : i64} {
  func.func @encoder_kernel(%arg0: i32, %arg1: memref<2xi32, #tpu.memory_space<smem>>, %arg2: memref<1x8x32xf32, #tpu.memory_space<vmem>>, %arg3: memref<2x32x96xbf16, #tpu.memory_space<vmem>>, %arg4: memref<2x32x32xbf16, #tpu.memory_space<vmem>>, %arg5: memref<2x32x64xbf16, #tpu.memory_space<vmem>>, %arg6: memref<2x64x32xbf16, #tpu.memory_space<vmem>>, %arg7: memref<3x8x128xf32, #tpu.memory_space<vmem>>, %arg8: memref<1x8x32xf32, #tpu.memory_space<vmem>>) attributes {dimension_semantics = [#tpu.dimension_semantics<parallel>], iteration_bounds = array<i64: 2>, scalar_prefetch = 1 : i64, scratch_operands = 0 : i64, tpu.core_type = #tpu.core_type<tc>, window_params = [{transform_indices = @transform_0, window_bounds = array<i64: 1, 8, 32>}, {pipeline_mode = #tpu.pipeline_mode<synchronous>, transform_indices = @transform_1, window_bounds = array<i64: 2, 32, 96>}, {pipeline_mode = #tpu.pipeline_mode<synchronous>, transform_indices = @transform_2, window_bounds = array<i64: 2, 32, 32>}, {pipeline_mode = #tpu.pipeline_mode<synchronous>, transform_indices = @transform_3, window_bounds = array<i64: 2, 32, 64>}, {pipeline_mode = #tpu.pipeline_mode<synchronous>, transform_indices = @transform_4, window_bounds = array<i64: 2, 64, 32>}, {pipeline_mode = #tpu.pipeline_mode<synchronous>, transform_indices = @transform_5, window_bounds = array<i64: 3, 8, 128>}, {transform_indices = @transform_6, window_bounds = array<i64: 1, 8, 32>}]} {
    %0 = arith.index_cast %arg0 : i32 to index
    %1 = memref.load %arg1[%0] : memref<2xi32, #tpu.memory_space<smem>>
    %2 = tpu.iota {dimensions = array<i32: 1>} : vector<8x8xi32>
    %3 = vector.broadcast %1 : i32 to vector<8x8xi32>
    %4 = arith.cmpi slt, %2, %3 : vector<8x8xi32>
    %cst = arith.constant 0.000000e+00 : f32
    %cst_0 = arith.constant -1.000000e+09 : f32
    %5 = vector.broadcast %cst : f32 to vector<8x8xf32>
    %6 = vector.broadcast %cst_0 : f32 to vector<8x8xf32>
    %7 = arith.select %4, %5, %6 : vector<8x8xi1>, vector<8x8xf32>
    %c0 = arith.constant 0 : index
    %c0_1 = arith.constant 0 : index
    %c0_2 = arith.constant 0 : index
    %8 = vector.load %arg2[%c0, %c0_1, %c0_2] : memref<1x8x32xf32, #tpu.memory_space<vmem>>, vector<1x8x32xf32>
    %9 = vector.shape_cast %8 : vector<1x8x32xf32> to vector<8x32xf32>
    %c0_3 = arith.constant 0 : index
    %c0_4 = arith.constant 0 : index
    %c0_5 = arith.constant 0 : index
    %10 = vector.load %arg7[%c0_3, %c0_4, %c0_5] : memref<3x8x128xf32, #tpu.memory_space<vmem>>, vector<1x1x96xf32>
    %11 = vector.shape_cast %10 : vector<1x1x96xf32> to vector<1x96xf32>
    %c0_6 = arith.constant 0 : index
    %c0_7 = arith.constant 0 : index
    %c96 = arith.constant 96 : index
    %12 = vector.load %arg7[%c0_6, %c0_7, %c96] : memref<3x8x128xf32, #tpu.memory_space<vmem>>, vector<1x1x32xf32>
    %13 = vector.shape_cast %12 : vector<1x1x32xf32> to vector<1x32xf32>
    %c0_8 = arith.constant 0 : index
    %c1 = arith.constant 1 : index
    %c0_9 = arith.constant 0 : index
    %14 = vector.load %arg7[%c0_8, %c1, %c0_9] : memref<3x8x128xf32, #tpu.memory_space<vmem>>, vector<1x1x32xf32>
    %15 = vector.shape_cast %14 : vector<1x1x32xf32> to vector<1x32xf32>
    %c0_10 = arith.constant 0 : index
    %c1_11 = arith.constant 1 : index
    %c32 = arith.constant 32 : index
    %16 = vector.load %arg7[%c0_10, %c1_11, %c32] : memref<3x8x128xf32, #tpu.memory_space<vmem>>, vector<1x1x32xf32>
    %17 = vector.shape_cast %16 : vector<1x1x32xf32> to vector<1x32xf32>
    %c0_12 = arith.constant 0 : index
    %c1_13 = arith.constant 1 : index
    %c64 = arith.constant 64 : index
    %18 = vector.load %arg7[%c0_12, %c1_13, %c64] : memref<3x8x128xf32, #tpu.memory_space<vmem>>, vector<1x1x32xf32>
    %19 = vector.shape_cast %18 : vector<1x1x32xf32> to vector<1x32xf32>
    %c0_14 = arith.constant 0 : index
    %c1_15 = arith.constant 1 : index
    %c96_16 = arith.constant 96 : index
    %20 = vector.load %arg7[%c0_14, %c1_15, %c96_16] : memref<3x8x128xf32, #tpu.memory_space<vmem>>, vector<1x1x32xf32>
    %21 = vector.shape_cast %20 : vector<1x1x32xf32> to vector<1x32xf32>
    %c0_17 = arith.constant 0 : index
    %c2 = arith.constant 2 : index
    %c0_18 = arith.constant 0 : index
    %22 = vector.load %arg7[%c0_17, %c2, %c0_18] : memref<3x8x128xf32, #tpu.memory_space<vmem>>, vector<1x1x64xf32>
    %23 = vector.shape_cast %22 : vector<1x1x64xf32> to vector<1x64xf32>
    %c0_19 = arith.constant 0 : index
    %c2_20 = arith.constant 2 : index
    %c64_21 = arith.constant 64 : index
    %24 = vector.load %arg7[%c0_19, %c2_20, %c64_21] : memref<3x8x128xf32, #tpu.memory_space<vmem>>, vector<1x1x32xf32>
    %25 = vector.shape_cast %24 : vector<1x1x32xf32> to vector<1x32xf32>
    %26 = arith.truncf %9 : vector<8x32xf32> to vector<8x32xbf16>
    %c0_22 = arith.constant 0 : index
    %c0_23 = arith.constant 0 : index
    %c0_24 = arith.constant 0 : index
    %27 = vector.load %arg3[%c0_22, %c0_23, %c0_24] : memref<2x32x96xbf16, #tpu.memory_space<vmem>>, vector<1x32x96xbf16>
    %28 = vector.shape_cast %27 : vector<1x32x96xbf16> to vector<32x96xbf16>
    %cst_25 = arith.constant dense<0.000000e+00> : vector<8x96xf32>
    %29 = tpu.matmul %26, %28, %cst_25 {dimension_numbers = #tpu.dot_dimension_numbers<[1], [0], [0], [1], [0, 0, 1, 1], [], []>} : vector<8x32xbf16>, vector<32x96xbf16>, vector<8x96xf32> -> vector<8x96xf32>
    %30 = vector.broadcast %11 : vector<1x96xf32> to vector<8x96xf32>
    %31 = arith.addf %29, %30 : vector<8x96xf32>
    %cst_26 = arith.constant 0.000000e+00 : f32
    %32 = vector.broadcast %cst_26 : f32 to vector<8x32xf32>
    %33 = vector.extract_strided_slice %31 {offsets = [0, 0], sizes = [8, 8], strides = [1, 1]} : vector<8x96xf32> to vector<8x8xf32>
    %34 = vector.extract_strided_slice %31 {offsets = [0, 32], sizes = [8, 8], strides = [1, 1]} : vector<8x96xf32> to vector<8x8xf32>
    %35 = vector.extract_strided_slice %31 {offsets = [0, 64], sizes = [8, 8], strides = [1, 1]} : vector<8x96xf32> to vector<8x8xf32>
    %36 = arith.truncf %33 : vector<8x8xf32> to vector<8x8xbf16>
    %37 = arith.truncf %34 : vector<8x8xf32> to vector<8x8xbf16>
    %cst_27 = arith.constant dense<0.000000e+00> : vector<8x8xf32>
    %38 = tpu.matmul %36, %37, %cst_27 {dimension_numbers = #tpu.dot_dimension_numbers<[1], [1], [0], [0], [0, 0, 1, 0], [], []>} : vector<8x8xbf16>, vector<8x8xbf16>, vector<8x8xf32> -> vector<8x8xf32>
    %39 = arith.addf %38, %7 : vector<8x8xf32>
    %cst_28 = arith.constant dense<0xFF800000> : vector<8xf32>
    %40 = vector.multi_reduction <maximumf>, %39, %cst_28 [1] : vector<8x8xf32> to vector<8xf32>
    %41 = vector.shape_cast %40 : vector<8xf32> to vector<8x1xf32>
    %42 = vector.broadcast %41 : vector<8x1xf32> to vector<8x8xf32>
    %43 = arith.subf %39, %42 : vector<8x8xf32>
    %44 = math.exp %43 : vector<8x8xf32>
    %cst_29 = arith.constant dense<0.000000e+00> : vector<8xf32>
    %45 = vector.multi_reduction <add>, %44, %cst_29 [1] : vector<8x8xf32> to vector<8xf32>
    %46 = vector.shape_cast %45 : vector<8xf32> to vector<8x1xf32>
    %47 = vector.broadcast %46 : vector<8x1xf32> to vector<8x8xf32>
    %48 = arith.divf %44, %47 : vector<8x8xf32>
    %49 = arith.truncf %48 : vector<8x8xf32> to vector<8x8xbf16>
    %50 = arith.truncf %35 : vector<8x8xf32> to vector<8x8xbf16>
    %cst_30 = arith.constant dense<0.000000e+00> : vector<8x8xf32>
    %51 = tpu.matmul %49, %50, %cst_30 {dimension_numbers = #tpu.dot_dimension_numbers<[1], [0], [0], [1], [0, 0, 1, 1], [], []>} : vector<8x8xbf16>, vector<8x8xbf16>, vector<8x8xf32> -> vector<8x8xf32>
    %52 = arith.truncf %51 : vector<8x8xf32> to vector<8x8xbf16>
    %c0_31 = arith.constant 0 : index
    %c0_32 = arith.constant 0 : index
    %c0_33 = arith.constant 0 : index
    %53 = vector.load %arg4[%c0_31, %c0_32, %c0_33] : memref<2x32x32xbf16, #tpu.memory_space<vmem>>, vector<1x8x32xbf16>
    %54 = vector.shape_cast %53 : vector<1x8x32xbf16> to vector<8x32xbf16>
    %cst_34 = arith.constant dense<0.000000e+00> : vector<8x32xf32>
    %55 = tpu.matmul %52, %54, %cst_34 {dimension_numbers = #tpu.dot_dimension_numbers<[1], [0], [0], [1], [0, 0, 1, 1], [], []>} : vector<8x8xbf16>, vector<8x32xbf16>, vector<8x32xf32> -> vector<8x32xf32>
    %56 = arith.addf %32, %55 : vector<8x32xf32>
    %57 = vector.extract_strided_slice %31 {offsets = [0, 8], sizes = [8, 8], strides = [1, 1]} : vector<8x96xf32> to vector<8x8xf32>
    %58 = vector.extract_strided_slice %31 {offsets = [0, 40], sizes = [8, 8], strides = [1, 1]} : vector<8x96xf32> to vector<8x8xf32>
    %59 = vector.extract_strided_slice %31 {offsets = [0, 72], sizes = [8, 8], strides = [1, 1]} : vector<8x96xf32> to vector<8x8xf32>
    %60 = arith.truncf %57 : vector<8x8xf32> to vector<8x8xbf16>
    %61 = arith.truncf %58 : vector<8x8xf32> to vector<8x8xbf16>
    %cst_35 = arith.constant dense<0.000000e+00> : vector<8x8xf32>
    %62 = tpu.matmul %60, %61, %cst_35 {dimension_numbers = #tpu.dot_dimension_numbers<[1], [1], [0], [0], [0, 0, 1, 0], [], []>} : vector<8x8xbf16>, vector<8x8xbf16>, vector<8x8xf32> -> vector<8x8xf32>
    %63 = arith.addf %62, %7 : vector<8x8xf32>
    %cst_36 = arith.constant dense<0xFF800000> : vector<8xf32>
    %64 = vector.multi_reduction <maximumf>, %63, %cst_36 [1] : vector<8x8xf32> to vector<8xf32>
    %65 = vector.shape_cast %64 : vector<8xf32> to vector<8x1xf32>
    %66 = vector.broadcast %65 : vector<8x1xf32> to vector<8x8xf32>
    %67 = arith.subf %63, %66 : vector<8x8xf32>
    %68 = math.exp %67 : vector<8x8xf32>
    %cst_37 = arith.constant dense<0.000000e+00> : vector<8xf32>
    %69 = vector.multi_reduction <add>, %68, %cst_37 [1] : vector<8x8xf32> to vector<8xf32>
    %70 = vector.shape_cast %69 : vector<8xf32> to vector<8x1xf32>
    %71 = vector.broadcast %70 : vector<8x1xf32> to vector<8x8xf32>
    %72 = arith.divf %68, %71 : vector<8x8xf32>
    %73 = arith.truncf %72 : vector<8x8xf32> to vector<8x8xbf16>
    %74 = arith.truncf %59 : vector<8x8xf32> to vector<8x8xbf16>
    %cst_38 = arith.constant dense<0.000000e+00> : vector<8x8xf32>
    %75 = tpu.matmul %73, %74, %cst_38 {dimension_numbers = #tpu.dot_dimension_numbers<[1], [0], [0], [1], [0, 0, 1, 1], [], []>} : vector<8x8xbf16>, vector<8x8xbf16>, vector<8x8xf32> -> vector<8x8xf32>
    %76 = arith.truncf %75 : vector<8x8xf32> to vector<8x8xbf16>
    %c0_39 = arith.constant 0 : index
    %c8 = arith.constant 8 : index
    %c0_40 = arith.constant 0 : index
    %77 = vector.load %arg4[%c0_39, %c8, %c0_40] : memref<2x32x32xbf16, #tpu.memory_space<vmem>>, vector<1x8x32xbf16>
    %78 = vector.shape_cast %77 : vector<1x8x32xbf16> to vector<8x32xbf16>
    %cst_41 = arith.constant dense<0.000000e+00> : vector<8x32xf32>
    %79 = tpu.matmul %76, %78, %cst_41 {dimension_numbers = #tpu.dot_dimension_numbers<[1], [0], [0], [1], [0, 0, 1, 1], [], []>} : vector<8x8xbf16>, vector<8x32xbf16>, vector<8x32xf32> -> vector<8x32xf32>
    %80 = arith.addf %56, %79 : vector<8x32xf32>
    %81 = vector.extract_strided_slice %31 {offsets = [0, 16], sizes = [8, 8], strides = [1, 1]} : vector<8x96xf32> to vector<8x8xf32>
    %82 = vector.extract_strided_slice %31 {offsets = [0, 48], sizes = [8, 8], strides = [1, 1]} : vector<8x96xf32> to vector<8x8xf32>
    %83 = vector.extract_strided_slice %31 {offsets = [0, 80], sizes = [8, 8], strides = [1, 1]} : vector<8x96xf32> to vector<8x8xf32>
    %84 = arith.truncf %81 : vector<8x8xf32> to vector<8x8xbf16>
    %85 = arith.truncf %82 : vector<8x8xf32> to vector<8x8xbf16>
    %cst_42 = arith.constant dense<0.000000e+00> : vector<8x8xf32>
    %86 = tpu.matmul %84, %85, %cst_42 {dimension_numbers = #tpu.dot_dimension_numbers<[1], [1], [0], [0], [0, 0, 1, 0], [], []>} : vector<8x8xbf16>, vector<8x8xbf16>, vector<8x8xf32> -> vector<8x8xf32>
    %87 = arith.addf %86, %7 : vector<8x8xf32>
    %cst_43 = arith.constant dense<0xFF800000> : vector<8xf32>
    %88 = vector.multi_reduction <maximumf>, %87, %cst_43 [1] : vector<8x8xf32> to vector<8xf32>
    %89 = vector.shape_cast %88 : vector<8xf32> to vector<8x1xf32>
    %90 = vector.broadcast %89 : vector<8x1xf32> to vector<8x8xf32>
    %91 = arith.subf %87, %90 : vector<8x8xf32>
    %92 = math.exp %91 : vector<8x8xf32>
    %cst_44 = arith.constant dense<0.000000e+00> : vector<8xf32>
    %93 = vector.multi_reduction <add>, %92, %cst_44 [1] : vector<8x8xf32> to vector<8xf32>
    %94 = vector.shape_cast %93 : vector<8xf32> to vector<8x1xf32>
    %95 = vector.broadcast %94 : vector<8x1xf32> to vector<8x8xf32>
    %96 = arith.divf %92, %95 : vector<8x8xf32>
    %97 = arith.truncf %96 : vector<8x8xf32> to vector<8x8xbf16>
    %98 = arith.truncf %83 : vector<8x8xf32> to vector<8x8xbf16>
    %cst_45 = arith.constant dense<0.000000e+00> : vector<8x8xf32>
    %99 = tpu.matmul %97, %98, %cst_45 {dimension_numbers = #tpu.dot_dimension_numbers<[1], [0], [0], [1], [0, 0, 1, 1], [], []>} : vector<8x8xbf16>, vector<8x8xbf16>, vector<8x8xf32> -> vector<8x8xf32>
    %100 = arith.truncf %99 : vector<8x8xf32> to vector<8x8xbf16>
    %c0_46 = arith.constant 0 : index
    %c16 = arith.constant 16 : index
    %c0_47 = arith.constant 0 : index
    %101 = vector.load %arg4[%c0_46, %c16, %c0_47] : memref<2x32x32xbf16, #tpu.memory_space<vmem>>, vector<1x8x32xbf16>
    %102 = vector.shape_cast %101 : vector<1x8x32xbf16> to vector<8x32xbf16>
    %cst_48 = arith.constant dense<0.000000e+00> : vector<8x32xf32>
    %103 = tpu.matmul %100, %102, %cst_48 {dimension_numbers = #tpu.dot_dimension_numbers<[1], [0], [0], [1], [0, 0, 1, 1], [], []>} : vector<8x8xbf16>, vector<8x32xbf16>, vector<8x32xf32> -> vector<8x32xf32>
    %104 = arith.addf %80, %103 : vector<8x32xf32>
    %105 = vector.extract_strided_slice %31 {offsets = [0, 24], sizes = [8, 8], strides = [1, 1]} : vector<8x96xf32> to vector<8x8xf32>
    %106 = vector.extract_strided_slice %31 {offsets = [0, 56], sizes = [8, 8], strides = [1, 1]} : vector<8x96xf32> to vector<8x8xf32>
    %107 = vector.extract_strided_slice %31 {offsets = [0, 88], sizes = [8, 8], strides = [1, 1]} : vector<8x96xf32> to vector<8x8xf32>
    %108 = arith.truncf %105 : vector<8x8xf32> to vector<8x8xbf16>
    %109 = arith.truncf %106 : vector<8x8xf32> to vector<8x8xbf16>
    %cst_49 = arith.constant dense<0.000000e+00> : vector<8x8xf32>
    %110 = tpu.matmul %108, %109, %cst_49 {dimension_numbers = #tpu.dot_dimension_numbers<[1], [1], [0], [0], [0, 0, 1, 0], [], []>} : vector<8x8xbf16>, vector<8x8xbf16>, vector<8x8xf32> -> vector<8x8xf32>
    %111 = arith.addf %110, %7 : vector<8x8xf32>
    %cst_50 = arith.constant dense<0xFF800000> : vector<8xf32>
    %112 = vector.multi_reduction <maximumf>, %111, %cst_50 [1] : vector<8x8xf32> to vector<8xf32>
    %113 = vector.shape_cast %112 : vector<8xf32> to vector<8x1xf32>
    %114 = vector.broadcast %113 : vector<8x1xf32> to vector<8x8xf32>
    %115 = arith.subf %111, %114 : vector<8x8xf32>
    %116 = math.exp %115 : vector<8x8xf32>
    %cst_51 = arith.constant dense<0.000000e+00> : vector<8xf32>
    %117 = vector.multi_reduction <add>, %116, %cst_51 [1] : vector<8x8xf32> to vector<8xf32>
    %118 = vector.shape_cast %117 : vector<8xf32> to vector<8x1xf32>
    %119 = vector.broadcast %118 : vector<8x1xf32> to vector<8x8xf32>
    %120 = arith.divf %116, %119 : vector<8x8xf32>
    %121 = arith.truncf %120 : vector<8x8xf32> to vector<8x8xbf16>
    %122 = arith.truncf %107 : vector<8x8xf32> to vector<8x8xbf16>
    %cst_52 = arith.constant dense<0.000000e+00> : vector<8x8xf32>
    %123 = tpu.matmul %121, %122, %cst_52 {dimension_numbers = #tpu.dot_dimension_numbers<[1], [0], [0], [1], [0, 0, 1, 1], [], []>} : vector<8x8xbf16>, vector<8x8xbf16>, vector<8x8xf32> -> vector<8x8xf32>
    %124 = arith.truncf %123 : vector<8x8xf32> to vector<8x8xbf16>
    %c0_53 = arith.constant 0 : index
    %c24 = arith.constant 24 : index
    %c0_54 = arith.constant 0 : index
    %125 = vector.load %arg4[%c0_53, %c24, %c0_54] : memref<2x32x32xbf16, #tpu.memory_space<vmem>>, vector<1x8x32xbf16>
    %126 = vector.shape_cast %125 : vector<1x8x32xbf16> to vector<8x32xbf16>
    %cst_55 = arith.constant dense<0.000000e+00> : vector<8x32xf32>
    %127 = tpu.matmul %124, %126, %cst_55 {dimension_numbers = #tpu.dot_dimension_numbers<[1], [0], [0], [1], [0, 0, 1, 1], [], []>} : vector<8x8xbf16>, vector<8x32xbf16>, vector<8x32xf32> -> vector<8x32xf32>
    %128 = arith.addf %104, %127 : vector<8x32xf32>
    %129 = vector.broadcast %13 : vector<1x32xf32> to vector<8x32xf32>
    %130 = arith.addf %128, %129 : vector<8x32xf32>
    %131 = arith.addf %9, %130 : vector<8x32xf32>
    %cst_56 = arith.constant dense<0.000000e+00> : vector<8xf32>
    %132 = vector.multi_reduction <add>, %131, %cst_56 [1] : vector<8x32xf32> to vector<8xf32>
    %133 = vector.shape_cast %132 : vector<8xf32> to vector<8x1xf32>
    %cst_57 = arith.constant 3.200000e+01 : f32
    %134 = vector.broadcast %cst_57 : f32 to vector<8x1xf32>
    %135 = arith.divf %133, %134 : vector<8x1xf32>
    %136 = vector.broadcast %135 : vector<8x1xf32> to vector<8x32xf32>
    %137 = arith.subf %131, %136 : vector<8x32xf32>
    %138 = arith.mulf %137, %137 : vector<8x32xf32>
    %cst_58 = arith.constant dense<0.000000e+00> : vector<8xf32>
    %139 = vector.multi_reduction <add>, %138, %cst_58 [1] : vector<8x32xf32> to vector<8xf32>
    %140 = vector.shape_cast %139 : vector<8xf32> to vector<8x1xf32>
    %cst_59 = arith.constant 3.200000e+01 : f32
    %141 = vector.broadcast %cst_59 : f32 to vector<8x1xf32>
    %142 = arith.divf %140, %141 : vector<8x1xf32>
    %143 = vector.broadcast %135 : vector<8x1xf32> to vector<8x32xf32>
    %144 = arith.subf %131, %143 : vector<8x32xf32>
    %cst_60 = arith.constant 9.99999997E-7 : f32
    %145 = vector.broadcast %cst_60 : f32 to vector<8x1xf32>
    %146 = arith.addf %142, %145 : vector<8x1xf32>
    %147 = math.rsqrt %146 : vector<8x1xf32>
    %148 = vector.broadcast %147 : vector<8x1xf32> to vector<8x32xf32>
    %149 = arith.mulf %144, %148 : vector<8x32xf32>
    %150 = vector.broadcast %15 : vector<1x32xf32> to vector<8x32xf32>
    %151 = arith.mulf %149, %150 : vector<8x32xf32>
    %152 = vector.broadcast %17 : vector<1x32xf32> to vector<8x32xf32>
    %153 = arith.addf %151, %152 : vector<8x32xf32>
    %154 = arith.truncf %153 : vector<8x32xf32> to vector<8x32xbf16>
    %c0_61 = arith.constant 0 : index
    %c0_62 = arith.constant 0 : index
    %c0_63 = arith.constant 0 : index
    %155 = vector.load %arg5[%c0_61, %c0_62, %c0_63] : memref<2x32x64xbf16, #tpu.memory_space<vmem>>, vector<1x32x64xbf16>
    %156 = vector.shape_cast %155 : vector<1x32x64xbf16> to vector<32x64xbf16>
    %cst_64 = arith.constant dense<0.000000e+00> : vector<8x64xf32>
    %157 = tpu.matmul %154, %156, %cst_64 {dimension_numbers = #tpu.dot_dimension_numbers<[1], [0], [0], [1], [0, 0, 1, 1], [], []>} : vector<8x32xbf16>, vector<32x64xbf16>, vector<8x64xf32> -> vector<8x64xf32>
    %158 = vector.broadcast %23 : vector<1x64xf32> to vector<8x64xf32>
    %159 = arith.addf %157, %158 : vector<8x64xf32>
    %cst_65 = arith.constant 0.000000e+00 : f32
    %160 = vector.broadcast %cst_65 : f32 to vector<8x64xf32>
    %161 = arith.maximumf %159, %160 : vector<8x64xf32>
    %162 = arith.truncf %161 : vector<8x64xf32> to vector<8x64xbf16>
    %c0_66 = arith.constant 0 : index
    %c0_67 = arith.constant 0 : index
    %c0_68 = arith.constant 0 : index
    %163 = vector.load %arg6[%c0_66, %c0_67, %c0_68] : memref<2x64x32xbf16, #tpu.memory_space<vmem>>, vector<1x64x32xbf16>
    %164 = vector.shape_cast %163 : vector<1x64x32xbf16> to vector<64x32xbf16>
    %cst_69 = arith.constant dense<0.000000e+00> : vector<8x32xf32>
    %165 = tpu.matmul %162, %164, %cst_69 {dimension_numbers = #tpu.dot_dimension_numbers<[1], [0], [0], [1], [0, 0, 1, 1], [], []>} : vector<8x64xbf16>, vector<64x32xbf16>, vector<8x32xf32> -> vector<8x32xf32>
    %166 = vector.broadcast %25 : vector<1x32xf32> to vector<8x32xf32>
    %167 = arith.addf %165, %166 : vector<8x32xf32>
    %168 = arith.addf %153, %167 : vector<8x32xf32>
    %cst_70 = arith.constant dense<0.000000e+00> : vector<8xf32>
    %169 = vector.multi_reduction <add>, %168, %cst_70 [1] : vector<8x32xf32> to vector<8xf32>
    %170 = vector.shape_cast %169 : vector<8xf32> to vector<8x1xf32>
    %cst_71 = arith.constant 3.200000e+01 : f32
    %171 = vector.broadcast %cst_71 : f32 to vector<8x1xf32>
    %172 = arith.divf %170, %171 : vector<8x1xf32>
    %173 = vector.broadcast %172 : vector<8x1xf32> to vector<8x32xf32>
    %174 = arith.subf %168, %173 : vector<8x32xf32>
    %175 = arith.mulf %174, %174 : vector<8x32xf32>
    %cst_72 = arith.constant dense<0.000000e+00> : vector<8xf32>
    %176 = vector.multi_reduction <add>, %175, %cst_72 [1] : vector<8x32xf32> to vector<8xf32>
    %177 = vector.shape_cast %176 : vector<8xf32> to vector<8x1xf32>
    %cst_73 = arith.constant 3.200000e+01 : f32
    %178 = vector.broadcast %cst_73 : f32 to vector<8x1xf32>
    %179 = arith.divf %177, %178 : vector<8x1xf32>
    %180 = vector.broadcast %172 : vector<8x1xf32> to vector<8x32xf32>
    %181 = arith.subf %168, %180 : vector<8x32xf32>
    %cst_74 = arith.constant 9.99999997E-7 : f32
    %182 = vector.broadcast %cst_74 : f32 to vector<8x1xf32>
    %183 = arith.addf %179, %182 : vector<8x1xf32>
    %184 = math.rsqrt %183 : vector<8x1xf32>
    %185 = vector.broadcast %184 : vector<8x1xf32> to vector<8x32xf32>
    %186 = arith.mulf %181, %185 : vector<8x32xf32>
    %187 = vector.broadcast %19 : vector<1x32xf32> to vector<8x32xf32>
    %188 = arith.mulf %186, %187 : vector<8x32xf32>
    %189 = vector.broadcast %21 : vector<1x32xf32> to vector<8x32xf32>
    %190 = arith.addf %188, %189 : vector<8x32xf32>
    %c1_75 = arith.constant 1 : index
    %c0_76 = arith.constant 0 : index
    %c0_77 = arith.constant 0 : index
    %191 = vector.load %arg7[%c1_75, %c0_76, %c0_77] : memref<3x8x128xf32, #tpu.memory_space<vmem>>, vector<1x1x96xf32>
    %192 = vector.shape_cast %191 : vector<1x1x96xf32> to vector<1x96xf32>
    %c1_78 = arith.constant 1 : index
    %c0_79 = arith.constant 0 : index
    %c96_80 = arith.constant 96 : index
    %193 = vector.load %arg7[%c1_78, %c0_79, %c96_80] : memref<3x8x128xf32, #tpu.memory_space<vmem>>, vector<1x1x32xf32>
    %194 = vector.shape_cast %193 : vector<1x1x32xf32> to vector<1x32xf32>
    %c1_81 = arith.constant 1 : index
    %c1_82 = arith.constant 1 : index
    %c0_83 = arith.constant 0 : index
    %195 = vector.load %arg7[%c1_81, %c1_82, %c0_83] : memref<3x8x128xf32, #tpu.memory_space<vmem>>, vector<1x1x32xf32>
    %196 = vector.shape_cast %195 : vector<1x1x32xf32> to vector<1x32xf32>
    %c1_84 = arith.constant 1 : index
    %c1_85 = arith.constant 1 : index
    %c32_86 = arith.constant 32 : index
    %197 = vector.load %arg7[%c1_84, %c1_85, %c32_86] : memref<3x8x128xf32, #tpu.memory_space<vmem>>, vector<1x1x32xf32>
    %198 = vector.shape_cast %197 : vector<1x1x32xf32> to vector<1x32xf32>
    %c1_87 = arith.constant 1 : index
    %c1_88 = arith.constant 1 : index
    %c64_89 = arith.constant 64 : index
    %199 = vector.load %arg7[%c1_87, %c1_88, %c64_89] : memref<3x8x128xf32, #tpu.memory_space<vmem>>, vector<1x1x32xf32>
    %200 = vector.shape_cast %199 : vector<1x1x32xf32> to vector<1x32xf32>
    %c1_90 = arith.constant 1 : index
    %c1_91 = arith.constant 1 : index
    %c96_92 = arith.constant 96 : index
    %201 = vector.load %arg7[%c1_90, %c1_91, %c96_92] : memref<3x8x128xf32, #tpu.memory_space<vmem>>, vector<1x1x32xf32>
    %202 = vector.shape_cast %201 : vector<1x1x32xf32> to vector<1x32xf32>
    %c1_93 = arith.constant 1 : index
    %c2_94 = arith.constant 2 : index
    %c0_95 = arith.constant 0 : index
    %203 = vector.load %arg7[%c1_93, %c2_94, %c0_95] : memref<3x8x128xf32, #tpu.memory_space<vmem>>, vector<1x1x64xf32>
    %204 = vector.shape_cast %203 : vector<1x1x64xf32> to vector<1x64xf32>
    %c1_96 = arith.constant 1 : index
    %c2_97 = arith.constant 2 : index
    %c64_98 = arith.constant 64 : index
    %205 = vector.load %arg7[%c1_96, %c2_97, %c64_98] : memref<3x8x128xf32, #tpu.memory_space<vmem>>, vector<1x1x32xf32>
    %206 = vector.shape_cast %205 : vector<1x1x32xf32> to vector<1x32xf32>
    %207 = arith.truncf %190 : vector<8x32xf32> to vector<8x32xbf16>
    %c1_99 = arith.constant 1 : index
    %c0_100 = arith.constant 0 : index
    %c0_101 = arith.constant 0 : index
    %208 = vector.load %arg3[%c1_99, %c0_100, %c0_101] : memref<2x32x96xbf16, #tpu.memory_space<vmem>>, vector<1x32x96xbf16>
    %209 = vector.shape_cast %208 : vector<1x32x96xbf16> to vector<32x96xbf16>
    %cst_102 = arith.constant dense<0.000000e+00> : vector<8x96xf32>
    %210 = tpu.matmul %207, %209, %cst_102 {dimension_numbers = #tpu.dot_dimension_numbers<[1], [0], [0], [1], [0, 0, 1, 1], [], []>} : vector<8x32xbf16>, vector<32x96xbf16>, vector<8x96xf32> -> vector<8x96xf32>
    %211 = vector.broadcast %192 : vector<1x96xf32> to vector<8x96xf32>
    %212 = arith.addf %210, %211 : vector<8x96xf32>
    %cst_103 = arith.constant 0.000000e+00 : f32
    %213 = vector.broadcast %cst_103 : f32 to vector<8x32xf32>
    %214 = vector.extract_strided_slice %212 {offsets = [0, 0], sizes = [8, 8], strides = [1, 1]} : vector<8x96xf32> to vector<8x8xf32>
    %215 = vector.extract_strided_slice %212 {offsets = [0, 32], sizes = [8, 8], strides = [1, 1]} : vector<8x96xf32> to vector<8x8xf32>
    %216 = vector.extract_strided_slice %212 {offsets = [0, 64], sizes = [8, 8], strides = [1, 1]} : vector<8x96xf32> to vector<8x8xf32>
    %217 = arith.truncf %214 : vector<8x8xf32> to vector<8x8xbf16>
    %218 = arith.truncf %215 : vector<8x8xf32> to vector<8x8xbf16>
    %cst_104 = arith.constant dense<0.000000e+00> : vector<8x8xf32>
    %219 = tpu.matmul %217, %218, %cst_104 {dimension_numbers = #tpu.dot_dimension_numbers<[1], [1], [0], [0], [0, 0, 1, 0], [], []>} : vector<8x8xbf16>, vector<8x8xbf16>, vector<8x8xf32> -> vector<8x8xf32>
    %220 = arith.addf %219, %7 : vector<8x8xf32>
    %cst_105 = arith.constant dense<0xFF800000> : vector<8xf32>
    %221 = vector.multi_reduction <maximumf>, %220, %cst_105 [1] : vector<8x8xf32> to vector<8xf32>
    %222 = vector.shape_cast %221 : vector<8xf32> to vector<8x1xf32>
    %223 = vector.broadcast %222 : vector<8x1xf32> to vector<8x8xf32>
    %224 = arith.subf %220, %223 : vector<8x8xf32>
    %225 = math.exp %224 : vector<8x8xf32>
    %cst_106 = arith.constant dense<0.000000e+00> : vector<8xf32>
    %226 = vector.multi_reduction <add>, %225, %cst_106 [1] : vector<8x8xf32> to vector<8xf32>
    %227 = vector.shape_cast %226 : vector<8xf32> to vector<8x1xf32>
    %228 = vector.broadcast %227 : vector<8x1xf32> to vector<8x8xf32>
    %229 = arith.divf %225, %228 : vector<8x8xf32>
    %230 = arith.truncf %229 : vector<8x8xf32> to vector<8x8xbf16>
    %231 = arith.truncf %216 : vector<8x8xf32> to vector<8x8xbf16>
    %cst_107 = arith.constant dense<0.000000e+00> : vector<8x8xf32>
    %232 = tpu.matmul %230, %231, %cst_107 {dimension_numbers = #tpu.dot_dimension_numbers<[1], [0], [0], [1], [0, 0, 1, 1], [], []>} : vector<8x8xbf16>, vector<8x8xbf16>, vector<8x8xf32> -> vector<8x8xf32>
    %233 = arith.truncf %232 : vector<8x8xf32> to vector<8x8xbf16>
    %c1_108 = arith.constant 1 : index
    %c0_109 = arith.constant 0 : index
    %c0_110 = arith.constant 0 : index
    %234 = vector.load %arg4[%c1_108, %c0_109, %c0_110] : memref<2x32x32xbf16, #tpu.memory_space<vmem>>, vector<1x8x32xbf16>
    %235 = vector.shape_cast %234 : vector<1x8x32xbf16> to vector<8x32xbf16>
    %cst_111 = arith.constant dense<0.000000e+00> : vector<8x32xf32>
    %236 = tpu.matmul %233, %235, %cst_111 {dimension_numbers = #tpu.dot_dimension_numbers<[1], [0], [0], [1], [0, 0, 1, 1], [], []>} : vector<8x8xbf16>, vector<8x32xbf16>, vector<8x32xf32> -> vector<8x32xf32>
    %237 = arith.addf %213, %236 : vector<8x32xf32>
    %238 = vector.extract_strided_slice %212 {offsets = [0, 8], sizes = [8, 8], strides = [1, 1]} : vector<8x96xf32> to vector<8x8xf32>
    %239 = vector.extract_strided_slice %212 {offsets = [0, 40], sizes = [8, 8], strides = [1, 1]} : vector<8x96xf32> to vector<8x8xf32>
    %240 = vector.extract_strided_slice %212 {offsets = [0, 72], sizes = [8, 8], strides = [1, 1]} : vector<8x96xf32> to vector<8x8xf32>
    %241 = arith.truncf %238 : vector<8x8xf32> to vector<8x8xbf16>
    %242 = arith.truncf %239 : vector<8x8xf32> to vector<8x8xbf16>
    %cst_112 = arith.constant dense<0.000000e+00> : vector<8x8xf32>
    %243 = tpu.matmul %241, %242, %cst_112 {dimension_numbers = #tpu.dot_dimension_numbers<[1], [1], [0], [0], [0, 0, 1, 0], [], []>} : vector<8x8xbf16>, vector<8x8xbf16>, vector<8x8xf32> -> vector<8x8xf32>
    %244 = arith.addf %243, %7 : vector<8x8xf32>
    %cst_113 = arith.constant dense<0xFF800000> : vector<8xf32>
    %245 = vector.multi_reduction <maximumf>, %244, %cst_113 [1] : vector<8x8xf32> to vector<8xf32>
    %246 = vector.shape_cast %245 : vector<8xf32> to vector<8x1xf32>
    %247 = vector.broadcast %246 : vector<8x1xf32> to vector<8x8xf32>
    %248 = arith.subf %244, %247 : vector<8x8xf32>
    %249 = math.exp %248 : vector<8x8xf32>
    %cst_114 = arith.constant dense<0.000000e+00> : vector<8xf32>
    %250 = vector.multi_reduction <add>, %249, %cst_114 [1] : vector<8x8xf32> to vector<8xf32>
    %251 = vector.shape_cast %250 : vector<8xf32> to vector<8x1xf32>
    %252 = vector.broadcast %251 : vector<8x1xf32> to vector<8x8xf32>
    %253 = arith.divf %249, %252 : vector<8x8xf32>
    %254 = arith.truncf %253 : vector<8x8xf32> to vector<8x8xbf16>
    %255 = arith.truncf %240 : vector<8x8xf32> to vector<8x8xbf16>
    %cst_115 = arith.constant dense<0.000000e+00> : vector<8x8xf32>
    %256 = tpu.matmul %254, %255, %cst_115 {dimension_numbers = #tpu.dot_dimension_numbers<[1], [0], [0], [1], [0, 0, 1, 1], [], []>} : vector<8x8xbf16>, vector<8x8xbf16>, vector<8x8xf32> -> vector<8x8xf32>
    %257 = arith.truncf %256 : vector<8x8xf32> to vector<8x8xbf16>
    %c1_116 = arith.constant 1 : index
    %c8_117 = arith.constant 8 : index
    %c0_118 = arith.constant 0 : index
    %258 = vector.load %arg4[%c1_116, %c8_117, %c0_118] : memref<2x32x32xbf16, #tpu.memory_space<vmem>>, vector<1x8x32xbf16>
    %259 = vector.shape_cast %258 : vector<1x8x32xbf16> to vector<8x32xbf16>
    %cst_119 = arith.constant dense<0.000000e+00> : vector<8x32xf32>
    %260 = tpu.matmul %257, %259, %cst_119 {dimension_numbers = #tpu.dot_dimension_numbers<[1], [0], [0], [1], [0, 0, 1, 1], [], []>} : vector<8x8xbf16>, vector<8x32xbf16>, vector<8x32xf32> -> vector<8x32xf32>
    %261 = arith.addf %237, %260 : vector<8x32xf32>
    %262 = vector.extract_strided_slice %212 {offsets = [0, 16], sizes = [8, 8], strides = [1, 1]} : vector<8x96xf32> to vector<8x8xf32>
    %263 = vector.extract_strided_slice %212 {offsets = [0, 48], sizes = [8, 8], strides = [1, 1]} : vector<8x96xf32> to vector<8x8xf32>
    %264 = vector.extract_strided_slice %212 {offsets = [0, 80], sizes = [8, 8], strides = [1, 1]} : vector<8x96xf32> to vector<8x8xf32>
    %265 = arith.truncf %262 : vector<8x8xf32> to vector<8x8xbf16>
    %266 = arith.truncf %263 : vector<8x8xf32> to vector<8x8xbf16>
    %cst_120 = arith.constant dense<0.000000e+00> : vector<8x8xf32>
    %267 = tpu.matmul %265, %266, %cst_120 {dimension_numbers = #tpu.dot_dimension_numbers<[1], [1], [0], [0], [0, 0, 1, 0], [], []>} : vector<8x8xbf16>, vector<8x8xbf16>, vector<8x8xf32> -> vector<8x8xf32>
    %268 = arith.addf %267, %7 : vector<8x8xf32>
    %cst_121 = arith.constant dense<0xFF800000> : vector<8xf32>
    %269 = vector.multi_reduction <maximumf>, %268, %cst_121 [1] : vector<8x8xf32> to vector<8xf32>
    %270 = vector.shape_cast %269 : vector<8xf32> to vector<8x1xf32>
    %271 = vector.broadcast %270 : vector<8x1xf32> to vector<8x8xf32>
    %272 = arith.subf %268, %271 : vector<8x8xf32>
    %273 = math.exp %272 : vector<8x8xf32>
    %cst_122 = arith.constant dense<0.000000e+00> : vector<8xf32>
    %274 = vector.multi_reduction <add>, %273, %cst_122 [1] : vector<8x8xf32> to vector<8xf32>
    %275 = vector.shape_cast %274 : vector<8xf32> to vector<8x1xf32>
    %276 = vector.broadcast %275 : vector<8x1xf32> to vector<8x8xf32>
    %277 = arith.divf %273, %276 : vector<8x8xf32>
    %278 = arith.truncf %277 : vector<8x8xf32> to vector<8x8xbf16>
    %279 = arith.truncf %264 : vector<8x8xf32> to vector<8x8xbf16>
    %cst_123 = arith.constant dense<0.000000e+00> : vector<8x8xf32>
    %280 = tpu.matmul %278, %279, %cst_123 {dimension_numbers = #tpu.dot_dimension_numbers<[1], [0], [0], [1], [0, 0, 1, 1], [], []>} : vector<8x8xbf16>, vector<8x8xbf16>, vector<8x8xf32> -> vector<8x8xf32>
    %281 = arith.truncf %280 : vector<8x8xf32> to vector<8x8xbf16>
    %c1_124 = arith.constant 1 : index
    %c16_125 = arith.constant 16 : index
    %c0_126 = arith.constant 0 : index
    %282 = vector.load %arg4[%c1_124, %c16_125, %c0_126] : memref<2x32x32xbf16, #tpu.memory_space<vmem>>, vector<1x8x32xbf16>
    %283 = vector.shape_cast %282 : vector<1x8x32xbf16> to vector<8x32xbf16>
    %cst_127 = arith.constant dense<0.000000e+00> : vector<8x32xf32>
    %284 = tpu.matmul %281, %283, %cst_127 {dimension_numbers = #tpu.dot_dimension_numbers<[1], [0], [0], [1], [0, 0, 1, 1], [], []>} : vector<8x8xbf16>, vector<8x32xbf16>, vector<8x32xf32> -> vector<8x32xf32>
    %285 = arith.addf %261, %284 : vector<8x32xf32>
    %286 = vector.extract_strided_slice %212 {offsets = [0, 24], sizes = [8, 8], strides = [1, 1]} : vector<8x96xf32> to vector<8x8xf32>
    %287 = vector.extract_strided_slice %212 {offsets = [0, 56], sizes = [8, 8], strides = [1, 1]} : vector<8x96xf32> to vector<8x8xf32>
    %288 = vector.extract_strided_slice %212 {offsets = [0, 88], sizes = [8, 8], strides = [1, 1]} : vector<8x96xf32> to vector<8x8xf32>
    %289 = arith.truncf %286 : vector<8x8xf32> to vector<8x8xbf16>
    %290 = arith.truncf %287 : vector<8x8xf32> to vector<8x8xbf16>
    %cst_128 = arith.constant dense<0.000000e+00> : vector<8x8xf32>
    %291 = tpu.matmul %289, %290, %cst_128 {dimension_numbers = #tpu.dot_dimension_numbers<[1], [1], [0], [0], [0, 0, 1, 0], [], []>} : vector<8x8xbf16>, vector<8x8xbf16>, vector<8x8xf32> -> vector<8x8xf32>
    %292 = arith.addf %291, %7 : vector<8x8xf32>
    %cst_129 = arith.constant dense<0xFF800000> : vector<8xf32>
    %293 = vector.multi_reduction <maximumf>, %292, %cst_129 [1] : vector<8x8xf32> to vector<8xf32>
    %294 = vector.shape_cast %293 : vector<8xf32> to vector<8x1xf32>
    %295 = vector.broadcast %294 : vector<8x1xf32> to vector<8x8xf32>
    %296 = arith.subf %292, %295 : vector<8x8xf32>
    %297 = math.exp %296 : vector<8x8xf32>
    %cst_130 = arith.constant dense<0.000000e+00> : vector<8xf32>
    %298 = vector.multi_reduction <add>, %297, %cst_130 [1] : vector<8x8xf32> to vector<8xf32>
    %299 = vector.shape_cast %298 : vector<8xf32> to vector<8x1xf32>
    %300 = vector.broadcast %299 : vector<8x1xf32> to vector<8x8xf32>
    %301 = arith.divf %297, %300 : vector<8x8xf32>
    %302 = arith.truncf %301 : vector<8x8xf32> to vector<8x8xbf16>
    %303 = arith.truncf %288 : vector<8x8xf32> to vector<8x8xbf16>
    %cst_131 = arith.constant dense<0.000000e+00> : vector<8x8xf32>
    %304 = tpu.matmul %302, %303, %cst_131 {dimension_numbers = #tpu.dot_dimension_numbers<[1], [0], [0], [1], [0, 0, 1, 1], [], []>} : vector<8x8xbf16>, vector<8x8xbf16>, vector<8x8xf32> -> vector<8x8xf32>
    %305 = arith.truncf %304 : vector<8x8xf32> to vector<8x8xbf16>
    %c1_132 = arith.constant 1 : index
    %c24_133 = arith.constant 24 : index
    %c0_134 = arith.constant 0 : index
    %306 = vector.load %arg4[%c1_132, %c24_133, %c0_134] : memref<2x32x32xbf16, #tpu.memory_space<vmem>>, vector<1x8x32xbf16>
    %307 = vector.shape_cast %306 : vector<1x8x32xbf16> to vector<8x32xbf16>
    %cst_135 = arith.constant dense<0.000000e+00> : vector<8x32xf32>
    %308 = tpu.matmul %305, %307, %cst_135 {dimension_numbers = #tpu.dot_dimension_numbers<[1], [0], [0], [1], [0, 0, 1, 1], [], []>} : vector<8x8xbf16>, vector<8x32xbf16>, vector<8x32xf32> -> vector<8x32xf32>
    %309 = arith.addf %285, %308 : vector<8x32xf32>
    %310 = vector.broadcast %194 : vector<1x32xf32> to vector<8x32xf32>
    %311 = arith.addf %309, %310 : vector<8x32xf32>
    %312 = arith.addf %190, %311 : vector<8x32xf32>
    %cst_136 = arith.constant dense<0.000000e+00> : vector<8xf32>
    %313 = vector.multi_reduction <add>, %312, %cst_136 [1] : vector<8x32xf32> to vector<8xf32>
    %314 = vector.shape_cast %313 : vector<8xf32> to vector<8x1xf32>
    %cst_137 = arith.constant 3.200000e+01 : f32
    %315 = vector.broadcast %cst_137 : f32 to vector<8x1xf32>
    %316 = arith.divf %314, %315 : vector<8x1xf32>
    %317 = vector.broadcast %316 : vector<8x1xf32> to vector<8x32xf32>
    %318 = arith.subf %312, %317 : vector<8x32xf32>
    %319 = arith.mulf %318, %318 : vector<8x32xf32>
    %cst_138 = arith.constant dense<0.000000e+00> : vector<8xf32>
    %320 = vector.multi_reduction <add>, %319, %cst_138 [1] : vector<8x32xf32> to vector<8xf32>
    %321 = vector.shape_cast %320 : vector<8xf32> to vector<8x1xf32>
    %cst_139 = arith.constant 3.200000e+01 : f32
    %322 = vector.broadcast %cst_139 : f32 to vector<8x1xf32>
    %323 = arith.divf %321, %322 : vector<8x1xf32>
    %324 = vector.broadcast %316 : vector<8x1xf32> to vector<8x32xf32>
    %325 = arith.subf %312, %324 : vector<8x32xf32>
    %cst_140 = arith.constant 9.99999997E-7 : f32
    %326 = vector.broadcast %cst_140 : f32 to vector<8x1xf32>
    %327 = arith.addf %323, %326 : vector<8x1xf32>
    %328 = math.rsqrt %327 : vector<8x1xf32>
    %329 = vector.broadcast %328 : vector<8x1xf32> to vector<8x32xf32>
    %330 = arith.mulf %325, %329 : vector<8x32xf32>
    %331 = vector.broadcast %196 : vector<1x32xf32> to vector<8x32xf32>
    %332 = arith.mulf %330, %331 : vector<8x32xf32>
    %333 = vector.broadcast %198 : vector<1x32xf32> to vector<8x32xf32>
    %334 = arith.addf %332, %333 : vector<8x32xf32>
    %335 = arith.truncf %334 : vector<8x32xf32> to vector<8x32xbf16>
    %c1_141 = arith.constant 1 : index
    %c0_142 = arith.constant 0 : index
    %c0_143 = arith.constant 0 : index
    %336 = vector.load %arg5[%c1_141, %c0_142, %c0_143] : memref<2x32x64xbf16, #tpu.memory_space<vmem>>, vector<1x32x64xbf16>
    %337 = vector.shape_cast %336 : vector<1x32x64xbf16> to vector<32x64xbf16>
    %cst_144 = arith.constant dense<0.000000e+00> : vector<8x64xf32>
    %338 = tpu.matmul %335, %337, %cst_144 {dimension_numbers = #tpu.dot_dimension_numbers<[1], [0], [0], [1], [0, 0, 1, 1], [], []>} : vector<8x32xbf16>, vector<32x64xbf16>, vector<8x64xf32> -> vector<8x64xf32>
    %339 = vector.broadcast %204 : vector<1x64xf32> to vector<8x64xf32>
    %340 = arith.addf %338, %339 : vector<8x64xf32>
    %cst_145 = arith.constant 0.000000e+00 : f32
    %341 = vector.broadcast %cst_145 : f32 to vector<8x64xf32>
    %342 = arith.maximumf %340, %341 : vector<8x64xf32>
    %343 = arith.truncf %342 : vector<8x64xf32> to vector<8x64xbf16>
    %c1_146 = arith.constant 1 : index
    %c0_147 = arith.constant 0 : index
    %c0_148 = arith.constant 0 : index
    %344 = vector.load %arg6[%c1_146, %c0_147, %c0_148] : memref<2x64x32xbf16, #tpu.memory_space<vmem>>, vector<1x64x32xbf16>
    %345 = vector.shape_cast %344 : vector<1x64x32xbf16> to vector<64x32xbf16>
    %cst_149 = arith.constant dense<0.000000e+00> : vector<8x32xf32>
    %346 = tpu.matmul %343, %345, %cst_149 {dimension_numbers = #tpu.dot_dimension_numbers<[1], [0], [0], [1], [0, 0, 1, 1], [], []>} : vector<8x64xbf16>, vector<64x32xbf16>, vector<8x32xf32> -> vector<8x32xf32>
    %347 = vector.broadcast %206 : vector<1x32xf32> to vector<8x32xf32>
    %348 = arith.addf %346, %347 : vector<8x32xf32>
    %349 = arith.addf %334, %348 : vector<8x32xf32>
    %cst_150 = arith.constant dense<0.000000e+00> : vector<8xf32>
    %350 = vector.multi_reduction <add>, %349, %cst_150 [1] : vector<8x32xf32> to vector<8xf32>
    %351 = vector.shape_cast %350 : vector<8xf32> to vector<8x1xf32>
    %cst_151 = arith.constant 3.200000e+01 : f32
    %352 = vector.broadcast %cst_151 : f32 to vector<8x1xf32>
    %353 = arith.divf %351, %352 : vector<8x1xf32>
    %354 = vector.broadcast %353 : vector<8x1xf32> to vector<8x32xf32>
    %355 = arith.subf %349, %354 : vector<8x32xf32>
    %356 = arith.mulf %355, %355 : vector<8x32xf32>
    %cst_152 = arith.constant dense<0.000000e+00> : vector<8xf32>
    %357 = vector.multi_reduction <add>, %356, %cst_152 [1] : vector<8x32xf32> to vector<8xf32>
    %358 = vector.shape_cast %357 : vector<8xf32> to vector<8x1xf32>
    %cst_153 = arith.constant 3.200000e+01 : f32
    %359 = vector.broadcast %cst_153 : f32 to vector<8x1xf32>
    %360 = arith.divf %358, %359 : vector<8x1xf32>
    %361 = vector.broadcast %353 : vector<8x1xf32> to vector<8x32xf32>
    %362 = arith.subf %349, %361 : vector<8x32xf32>
    %cst_154 = arith.constant 9.99999997E-7 : f32
    %363 = vector.broadcast %cst_154 : f32 to vector<8x1xf32>
    %364 = arith.addf %360, %363 : vector<8x1xf32>
    %365 = math.rsqrt %364 : vector<8x1xf32>
    %366 = vector.broadcast %365 : vector<8x1xf32> to vector<8x32xf32>
    %367 = arith.mulf %362, %366 : vector<8x32xf32>
    %368 = vector.broadcast %200 : vector<1x32xf32> to vector<8x32xf32>
    %369 = arith.mulf %367, %368 : vector<8x32xf32>
    %370 = vector.broadcast %202 : vector<1x32xf32> to vector<8x32xf32>
    %371 = arith.addf %369, %370 : vector<8x32xf32>
    %c2_155 = arith.constant 2 : index
    %c0_156 = arith.constant 0 : index
    %c0_157 = arith.constant 0 : index
    %372 = vector.load %arg7[%c2_155, %c0_156, %c0_157] : memref<3x8x128xf32, #tpu.memory_space<vmem>>, vector<1x1x32xf32>
    %373 = vector.shape_cast %372 : vector<1x1x32xf32> to vector<1x32xf32>
    %c2_158 = arith.constant 2 : index
    %c0_159 = arith.constant 0 : index
    %c32_160 = arith.constant 32 : index
    %374 = vector.load %arg7[%c2_158, %c0_159, %c32_160] : memref<3x8x128xf32, #tpu.memory_space<vmem>>, vector<1x1x32xf32>
    %375 = vector.shape_cast %374 : vector<1x1x32xf32> to vector<1x32xf32>
    %cst_161 = arith.constant dense<0.000000e+00> : vector<8xf32>
    %376 = vector.multi_reduction <add>, %371, %cst_161 [1] : vector<8x32xf32> to vector<8xf32>
    %377 = vector.shape_cast %376 : vector<8xf32> to vector<8x1xf32>
    %cst_162 = arith.constant 3.200000e+01 : f32
    %378 = vector.broadcast %cst_162 : f32 to vector<8x1xf32>
    %379 = arith.divf %377, %378 : vector<8x1xf32>
    %380 = vector.broadcast %379 : vector<8x1xf32> to vector<8x32xf32>
    %381 = arith.subf %371, %380 : vector<8x32xf32>
    %382 = arith.mulf %381, %381 : vector<8x32xf32>
    %cst_163 = arith.constant dense<0.000000e+00> : vector<8xf32>
    %383 = vector.multi_reduction <add>, %382, %cst_163 [1] : vector<8x32xf32> to vector<8xf32>
    %384 = vector.shape_cast %383 : vector<8xf32> to vector<8x1xf32>
    %cst_164 = arith.constant 3.200000e+01 : f32
    %385 = vector.broadcast %cst_164 : f32 to vector<8x1xf32>
    %386 = arith.divf %384, %385 : vector<8x1xf32>
    %387 = vector.broadcast %379 : vector<8x1xf32> to vector<8x32xf32>
    %388 = arith.subf %371, %387 : vector<8x32xf32>
    %cst_165 = arith.constant 9.99999997E-7 : f32
    %389 = vector.broadcast %cst_165 : f32 to vector<8x1xf32>
    %390 = arith.addf %386, %389 : vector<8x1xf32>
    %391 = math.rsqrt %390 : vector<8x1xf32>
    %392 = vector.broadcast %391 : vector<8x1xf32> to vector<8x32xf32>
    %393 = arith.mulf %388, %392 : vector<8x32xf32>
    %394 = vector.broadcast %373 : vector<1x32xf32> to vector<8x32xf32>
    %395 = arith.mulf %393, %394 : vector<8x32xf32>
    %396 = vector.broadcast %375 : vector<1x32xf32> to vector<8x32xf32>
    %397 = arith.addf %395, %396 : vector<8x32xf32>
    %c0_166 = arith.constant 0 : index
    %c0_167 = arith.constant 0 : index
    %c0_168 = arith.constant 0 : index
    %398 = vector.load %arg8[%c0_166, %c0_167, %c0_168] : memref<1x8x32xf32, #tpu.memory_space<vmem>>, vector<1x8x32xf32>
    %399 = vector.shape_cast %398 : vector<1x8x32xf32> to vector<8x32xf32>
    %400 = vector.shape_cast %397 : vector<8x32xf32> to vector<1x8x32xf32>
    tpu.vector_store %arg8[%c0_166, %c0_167, %c0_168], %400 {strides = array<i32>} : memref<1x8x32xf32, #tpu.memory_space<vmem>>, vector<1x8x32xf32>,
    return
  }
  func.func @transform_0(%arg0: i32, %arg1: memref<2xi32, #tpu.memory_space<smem>>) -> (i32, i32, i32) {
    %c0_i32 = arith.constant 0 : i32
    %c0_i32_0 = arith.constant 0 : i32
    %c0_i32_1 = arith.constant 0 : i32
    return %arg0, %c0_i32, %c0_i32_0 : i32, i32, i32
  }
  func.func @transform_1(%arg0: i32, %arg1: memref<2xi32, #tpu.memory_space<smem>>) -> (i32, i32, i32) {
    %c0_i32 = arith.constant 0 : i32
    %c0_i32_0 = arith.constant 0 : i32
    %c0_i32_1 = arith.constant 0 : i32
    %c0_i32_2 = arith.constant 0 : i32
    return %c0_i32, %c0_i32_0, %c0_i32_1 : i32, i32, i32
  }
  func.func @transform_2(%arg0: i32, %arg1: memref<2xi32, #tpu.memory_space<smem>>) -> (i32, i32, i32) {
    %c0_i32 = arith.constant 0 : i32
    %c0_i32_0 = arith.constant 0 : i32
    %c0_i32_1 = arith.constant 0 : i32
    %c0_i32_2 = arith.constant 0 : i32
    return %c0_i32, %c0_i32_0, %c0_i32_1 : i32, i32, i32
  }
  func.func @transform_3(%arg0: i32, %arg1: memref<2xi32, #tpu.memory_space<smem>>) -> (i32, i32, i32) {
    %c0_i32 = arith.constant 0 : i32
    %c0_i32_0 = arith.constant 0 : i32
    %c0_i32_1 = arith.constant 0 : i32
    %c0_i32_2 = arith.constant 0 : i32
    return %c0_i32, %c0_i32_0, %c0_i32_1 : i32, i32, i32
  }
  func.func @transform_4(%arg0: i32, %arg1: memref<2xi32, #tpu.memory_space<smem>>) -> (i32, i32, i32) {
    %c0_i32 = arith.constant 0 : i32
    %c0_i32_0 = arith.constant 0 : i32
    %c0_i32_1 = arith.constant 0 : i32
    %c0_i32_2 = arith.constant 0 : i32
    return %c0_i32, %c0_i32_0, %c0_i32_1 : i32, i32, i32
  }
  func.func @transform_5(%arg0: i32, %arg1: memref<2xi32, #tpu.memory_space<smem>>) -> (i32, i32, i32) {
    %c0_i32 = arith.constant 0 : i32
    %c0_i32_0 = arith.constant 0 : i32
    %c0_i32_1 = arith.constant 0 : i32
    %c0_i32_2 = arith.constant 0 : i32
    return %c0_i32, %c0_i32_0, %c0_i32_1 : i32, i32, i32
  }
  func.func @transform_6(%arg0: i32, %arg1: memref<2xi32, #tpu.memory_space<smem>>) -> (i32, i32, i32) {
    %c0_i32 = arith.constant 0 : i32
    %c0_i32_0 = arith.constant 0 : i32
    %c0_i32_1 = arith.constant 0 : i32
    return %arg0, %c0_i32, %c0_i32_0 : i32, i32, i32
  }
}

</mosaic_0001>

<bundles_post_ra>
// kernel: tpu_custom_call.1
= control target key start
LH: loop header
LB: loop body
LE: loop exit
PB: predicated region body
PF: predicated region fallthrough
CT: control target
= control target key end

     0   :  { %s2843_s24 = smov [#allocation3]   ;;  %s3420_s0 = inlined_call_operand.hbm [shape: s32[2], index: 0, kind: input, shape index: {}]   ;;  %s3421_s1 = inlined_call_operand.hbm [shape: f32[2,8,32], index: 1, kind: input, shape index: {}]   ;;  %s3422_s2 = inlined_call_operand.vmem [shape: bf16[2,32,96], index: 2, kind: input, shape index: {}]   ;;  %s3423_s3 = inlined_call_operand.vmem [shape: bf16[2,32,32], index: 3, kind: input, shape index: {}]   ;;  %s3424_s4 = inlined_call_operand.vmem [shape: bf16[2,32,64], index: 4, kind: input, shape index: {}]   ;;  %s3425_s5 = inlined_call_operand.vmem [shape: bf16[2,64,32], index: 5, kind: input, shape index: {}]   ;;  %s3426_s6 = inlined_call_operand.hbm [shape: f32[3,8,128], index: 6, kind: input, shape index: {}]   ;;  %s3427_s7 = inlined_call_operand.hbm [shape: f32[2,8,32], index: 7, kind: output, shape index: {}]  }
   0x1   :  { %3436 = sst [smem:[#allocation14_spill]] %s3426_s6 }
   0x2   :  { %13 = dma.hbm_to_smem %s3420_s0, 16, %s2843_s24, [#allocation2] }
   0x3   :  { %2813 = dma.done.wait [#allocation2], 16 }
   0x4   :  { %2814 = vsyncadd [#allocation2], 4294967280 }
   0x5   :  { %15 = sfence }
   0x6   :  { %16 = vsyncpa [#allocation5], 0 }
   0x7   :  { %18 = vsyncpa [#allocation5 + $0x1], 0 }
   0x8   :  { %19 = vsyncpa [#allocation8], 0 }
   0x9   :  { %20 = vsyncpa [#allocation6], 0 }
   0xa   :  { %22 = vsyncpa [#allocation6 + $0x1], 0  ;;  %s2907_s27 = smov 0   ;;  %s2909_s28 = smov 0  }
   0xb   :  { %s2911_s29 = smov 0   ;;  %s2913_s30 = smov 0  }
   0xc LB: > { %s2928_s0 = sadd.s32 4294967295, %s2841_s30   ;;  %s2219_s8 = sadd.s32 4294967294, %s2841_s30   ;;  %s2841_s30 = sphi %s2913_s30, %s3459_s30   ;;  %s2837_s29 = sphi %s2911_s29, %s3458_s29   ;;  %s2833_s28 = sphi %s2909_s28, %s3457_s28   ;;  %s2829_s27 = sphi %s2907_s27, %s3456_s27  }
   0xd   : > { %p48_p0 = scmp.ne.s32.totalorder %s2833_s28, %s2829_s27  ;;  %p3428_p1 = scmp.eq.s32.totalorder %s2928_s0, 0 }
   0xe   : > { %p183_p3 = scmp.eq.s32.totalorder %s2219_s8, 1  ;;  %p2220_p5 = scmp.ge.s32.totalorder %s2841_s30, 1 }
   0xf   : > { %p2937_p4 = por %p3428_p1, %p48_p0  ;;  %p190_p7 = scmp.lt.s32.totalorder %s2841_s30, 3 }
  0x10   : > { %p2942_p6 = por %p183_p3, %p48_p0  ;;  %s2844_s12 = smov [#allocation7]  }
  0x11   : > { %s3437_s9 = scalar_select %p2937_p4, 1, 0 }
  0x12   : > { %s3438_s10 = scalar_select %p2942_p6, 1, 0 }
  0x13   : > { %p2947_p8 = pnand %p2220_p5, %p190_p7  ;;  %s214_s13 = sshll.u32 %s2844_s12, 4  ;;  %s215_s13 = int_to_ptr.vmem [resolvable:$true] %s214_s13 }
  0x14   : > { %s2961_s15 = sadd.s32 1, %s2841_s30   ;;  %s35_s16 = sadd.s32 1, %s2837_s29 }
  0x15   : > { %s3439_s11 = scalar_select %p2947_p8, 1, 0 }
  0x16   : > { %p2584_p9 = pneg %p2947_p8  ;;  %s32_s17 = ssub.s32 %s2841_s30, %s2961_s15 }
  0x17   : > { %s2728_s18 = scalar_lea.vmem %s215_s13, 384  ;;  %p2736_p5 = scmp.lt.s32.totalorder %s215_s13, %s215_s13 }
  0x18   : > { %p2956_p11 = pnand %p2584_p9, %p3428_p1  ;;  %p2729_p13 = scmp.ne.s32.totalorder %s215_s13, %s2728_s18 }
  0x19   : > { %p2737_p7 = scmp.lt.s32.totalorder %s2728_s18, %s2728_s18 }
  0x1a   : > { %p2719_p12 = pneg %p2956_p11 }
  0x1b   : > { %p2738_p10 = por %p2737_p7, %p2736_p5 }
  0x1c   : > { %p2731_p0 = pnand %p2729_p13, %p2719_p12 }
  0x1e   : > { %p2732_p3 = pneg %p2731_p0 }
  0x20   : > { %p2739_p2 = pnand %p2738_p10, %p2732_p3 }
  0x22   : > { %2742 = shalt.err (!%p2739_p2)
}
  0x23   : > { %s2845_s19 = smov 128   ;;  %s2846_s20 = smov 8  }
  0x24   : > { %s3441_s6 = sld [smem:[#allocation14_spill]]  ;;  %p33_p9 = scmp.eq.s32.totalorder %s32_s17, 0 }
  0x25   : > { %p42_p12 = scmp.ne.s32.totalorder %s2837_s29, %s2833_s28  ;;  %p43_p10 = scmp.eq.s32.totalorder %s2841_s30, 0 }
  0x26   : > { %p2597_p2 = scmp.lt.s32.totalorder %s2841_s30, 2  ;;  %p3442_p0 = scmp.eq.s32.totalorder %s2928_s0, 1 }
  0x27   : > { %s2978_s23 = scalar_select %p33_p9, %s2837_s29, %s35_s16  }
  0x28   : > { %p44_p13 = por %p43_p10, %p42_p12  ;;  %p2982_p3 = por %p3442_p0, %p42_p12 }
  0x29   : > { %s228_s25 = sand.u32 1, %s2837_s29   ;;  %s2224_s26 = sshll.u32 %s2841_s30, 7 }
  0x2a   : > { %2587 = dma.hbm_to_vmem [thread:$0]  (!%p2956_p11), %s3441_s6, 384, %s215_s13, [#allocation8], %s2845_s19, %s2845_s19, %s2846_s20  }
  0x2b   : > { %s3443_s24 = scalar_select %p2982_p3, 1, 0 }
  0x2c   : > { %s2223_s8 = sshll.u32 %s228_s25, 3  ;;  %s2991_s18 = scalar_lea.hbm %s3421_s1, %s2224_s26 }
  0x2d   : > { %s232_s13 = scalar_lea.vmem [#allocation4], %s2223_s8  ;;  %p2993_p11 = pnand %p2597_p2, %p44_p13 }
  0x2e   : > { %s239_s16 = sshll.u32 %s232_s13, 4  ;;  %s229_s19 = scalar_lea.sflag [#allocation5], %s228_s25  ;;  %s240_s16 = int_to_ptr.vmem [resolvable:$true] %s239_s16 }
  0x2f   : > { %s2743_s20 = scalar_lea.hbm %s2991_s18, 128  ;;  %p2745_p7 = pneg %p2993_p11 }
  0x30   : > { %p2744_p5 = scmp.ne.s32.totalorder %s2991_s18, %s2743_s20  ;;  %s2748_s26 = scalar_lea.hbm %s3421_s1, 256 }
  0x31   : > { %p2749_p10 = scmp.lt.s32.totalorder %s2991_s18, %s3421_s1  ;;  %p2750_p2 = scmp.lt.s32.totalorder %s2748_s26, %s2743_s20 }
  0x32   : > { %p2746_p9 = pnand %p2745_p7, %p2744_p5 }
  0x33   : > { %p2751_p13 = por %p2750_p2, %p2749_p10 }
  0x34   : > { %p2747_p12 = pneg %p2746_p9 }
  0x36   : > { %p2752_p0 = pnand %p2751_p13, %p2747_p12 }
  0x38   : > { %2755 = shalt.err (!%p2752_p0)
}
  0x39   : > { %s2756_s14 = scalar_lea.vmem %s240_s16, 128  ;;  %s2847_s25 = smov [#allocation4]  }
  0x3a   : > { %p2757_p1 = scmp.ne.s32.totalorder %s240_s16, %s2756_s14  ;;  %s2761_s13 = sshll.u32 %s2847_s25, 4  ;;  %s2762_s13 = int_to_ptr.vmem [resolvable:$false] %s2761_s13 }
  0x3b   : > { %s2763_s6 = scalar_lea.vmem %s2762_s13, 256  ;;  %p2764_p5 = scmp.lt.s32.totalorder %s240_s16, %s2762_s13 }
  0x3c   : > { %p2759_p6 = pnand %p2757_p1, %p2745_p7  ;;  %p2765_p9 = scmp.lt.s32.totalorder %s2763_s6, %s2756_s14 }
  0x3e   : > { %p2760_p3 = pneg %p2759_p6  ;;  %p2766_p4 = por %p2765_p9, %p2764_p5 }
  0x40   : > { %p2767_p8 = pnand %p2766_p4, %p2760_p3 }
  0x42   : > { %2770 = shalt.err (!%p2767_p8)
}
  0x43   : > { %2591 = dma.hbm_to_vmem [thread:$0]  (!%p2993_p11), %s2991_s18, 128, %s240_s16, %s229_s19  }
  0x44   : > { %p3445_p12 = scmp.ne.s32.totalorder %s3439_s11, 0 }
  0x45   : > { %s3014_s20 = sand.u32 (!%p3445_p12), 1, %s2833_s28   ;;  %p3446_p1 = scmp.ne.s32.totalorder (!%p3445_p12), %s3437_s9, 0 }
  0x46   : > { %248 = sbr.rel (%p3445_p12) target bundleno = 7360 (0x1cc0), region = 44  ;;  %s3432_s21 = sshll.u32 (!%p3445_p12), %s3014_s20, 3 }
  0x47   : > { %s251_s22 = scalar_lea.sflag (!%p3445_p12), [#allocation5], %s3014_s20  ;;  %s254_s6 = scalar_lea.vmem (!%p3445_p12), [#allocation4], %s3432_s21 }
  0x4b   : > { %2816 = dma.done.wait (%p3446_p1), %s251_s22, 128  }
  0x4c   : > { %2818 = vsyncadd (%p3446_p1), %s251_s22, 4294967168  ;;  %p3447_p4 = scmp.eq.s32.totalorder %s2928_s0, 0 }
  0x4e   : > { %2820 = dma.done.wait (%p3447_p4), [#allocation8], 384   ;;  %p3448_p6 = pmov %p3447_p4 }
  0x4f   : > { %v2848_v0 = vmov 0.0   ;;  %vm2849_vm0 = vmmov 0   ;;  %v2651_v1 = vld [vmem:[%s3422_s2 + $0x8] sm:$0xff]   ;;  %v2652_v2 = vld [vmem:[%s3422_s2] sm:$0xff]   ;;  %vm319_vm1 = vcmask 261120   ;;  %s2850_s17 = smov 120   ;;  %v289_v17 = vlaneseq }
  0x50   : > { %2822 = vsyncadd (%p3448_p6), [#allocation8], 4294966912  ;;  %2376 = vmatprep.subr.bf16.mxu1 %v2848_v0  ;;  %2380 = vmatprep.mubr.msk.bf16.mxu1 %vm2849_vm0, %v2848_v0  ;;  %v3040_v3 = vld [vmem:[%s254_s6] sm:$0xff]  ;;  %v3049_v5 = vld [vmem:[#allocation7] ss:$0 sm:$0xff]  ;;  %s2851_s19 = smov 96  }
  0x51   : > { %2390 = vmatprep.subr.bf16.mxu0 %v2848_v0  ;;  %2392 = vmatprep.mubr.msk.bf16.mxu0 %vm2849_vm0, %v2848_v0  ;;  %v298_v4 = vpack.c.bf16 %v3040_v3, %v3040_v3  ;;  %s2852_s26 = smov 88   ;;  %vm367_vm2 = vcmask 64512   ;;  %s288_s12 = sld [smem:[#allocation3 + %s2928_s0]]  ;;  %v290_v18 = vand.u32 127, %v289_v17  ;;  %v2853_v20 = vmov -1e+09  }
  0x52   : > { %2377 = vmatpush3.bf16.msra.mxu1 %v2651_v1  ;;  %s2854_s8 = smov 64   ;;  %s2855_s14 = smov 56   ;;  %vm431_vm4 = vcmask 1043456   ;;  %v476_v56 = vld [vmem:[%s3423_s3] sm:$0xf]  ;;  %vm1131_vm5 = vcmask 523264  }
  0x53   : > { %2378 = vmatprep.subr.bf16.mxu1 %v2848_v0  ;;  %s2856_s25 = smov 112   ;;  %s2857_s13 = smov 80   ;;  %v639_v57 = vsel %vm431_vm4, %v476_v56, 0  ;;  %v588_v58 = vld [vmem:[%s3423_s3 + $0x4] sm:$0xf] }
  0x54   : > { %v593_v59 = vsel %vm431_vm4, %v588_v58, 0  ;;  %s2858_s18 = smov 72   ;;  %s3435_s16 = smov 104  }
  0x55   : > { %s3433_s9 = smov 40   ;;  %s2862_s6 = smov 32  }
  0x56   : > { %2379 = vmatpush3.bf16.msra.mxu1 %v2652_v2  ;;  %s3451_s11 = smov 40   ;;  %p3453_p3 = scmp.ne.s32.totalorder %s3443_s24, 0 }
  0x57   : > { %2384 = vmatprep.subr.bf16.mxu1 %v2848_v0  ;;  %v291_v19 = vstv %s288_s12  ;;  %s3434_s12 = smov 48  }
  0x58   : > { %vm292_vm3 = vcmp.lt.s32.totalorder %v290_v18, %v291_v19 }
  0x59   : > { %2381 = vmatmul.mubr.msk.bf16.vlgmr.msra.gmra.mxu1 %vm319_vm1, %v298_v4  ;;  %v3072_v21 = vsel %vm292_vm3, 0.0, %v2853_v20 }
  0x5a   : > { %2386 = vmatprep.mubr.msk.bf16.mxu1 %vm2849_vm0, %v2848_v0 }
 0x119   : > { %v357_v6 = vpop.f32.mrf.mxu1 }
 0x11a   : > { %v358_v7 = vadd.f32 %v3049_v5, %v357_v6 }
 0x11b   : > { %v2382_v8 = vpop.f32.mrf.mxu1 }
 0x11c   : > { %v3052_v9 = vpack.c.bf16 %v358_v7, %v358_v7 }
 0x11d   : > { %v360_v10 = vpop.f32.mrf.mxu1 }
 0x11e   : > { %477 = vrot.lane.b32.xlu1 %v3052_v9, %s2850_s17  ;;  %365 = vrot.lane.b32.xlu0 %v3052_v9, %s2851_s19 }
 0x11f   : > { %v2383_v11 = vpop.f32.mrf.mxu1 }
 0x122   : > { %479 = vrot.lane.b32.xlu0 %v3052_v9, %s2852_s26 }
 0x190   : > { %v366_v12 = vpop.permute.xlu0 %365  ;;  %v478_v16 = vpop.permute.xlu1 %477 }
 0x191   : > { %v372_v13 = vsel %vm367_vm2, %v366_v12, 0 }
 0x192   : > { %2385 = vmatpush3.bf16.xpose.msra.mxu1 %v372_v13 }
 0x193   : > { %2396 = vmatprep.subr.bf16.mxu1 %v2848_v0 }
 0x194   : > { %v480_v14 = vpop.permute.xlu0 %479 }
 0x195   : > { %v485_v15 = vsel %vm367_vm2, %v480_v14, 0 }
 0x199   : > { %2387 = vmatmul.mubr.msk.bf16.vlgmr.msra.gmra.mxu1 %vm367_vm2, %v3052_v9 }
 0x19a   : > { %2397 = vmatpush3.bf16.xpose.msra.mxu1 %v485_v15  ;;  %2398 = vmatprep.mubr.msk.bf16.mxu1 %vm2849_vm0, %v2848_v0 }
 0x19b   : > { %2408 = vmatprep.subr.bf16.mxu1 %v2848_v0 }
 0x1a1   : > { %2399 = vmatmul.mubr.msk.bf16.vlgmr.msra.gmra.mxu1 %vm367_vm2, %v478_v16 }
 0x1a2   : > { %2410 = vmatprep.mubr.msk.bf16.mxu1 %vm2849_vm0, %v2848_v0  ;;  %2409 = vmatpush3.bf16.msra.mxu1 %v593_v59 }
 0x1a3   : > { %2420 = vmatprep.subr.bf16.mxu1 %v2848_v0 }
 0x259   : > { %v408_v22 = vpop.f32.mrf.mxu1 }
 0x25a   : > { %v409_v23 = vadd.f32 %v408_v22, %v3072_v21 }
 0x25b   : > { %v2388_v24 = vpop.f32.mrf.mxu1 }
 0x25c   : > { %v414_v25 = vsel %vm367_vm2, %v409_v23, -inf }
 0x25d   : > { %v411_v26 = vpop.f32.mrf.mxu1  ;;  %415 = vmax.xlane.f32.xlu1 %v414_v25 }
 0x25f   : > { %v2389_v27 = vpop.f32.mrf.mxu1 }
 0x261   : > { %v521_v28 = vpop.f32.mrf.mxu1 }
 0x262   : > { %v522_v29 = vadd.f32 %v521_v28, %v3072_v21 }
 0x263   : > { %v2400_v30 = vpop.f32.mrf.mxu1 }
 0x264   : > { %v527_v31 = vsel %vm367_vm2, %v522_v29, -inf }
 0x265   : > { %v524_v32 = vpop.f32.mrf.mxu1  ;;  %528 = vmax.xlane.f32.xlu0 %v527_v31 }
 0x267   : > { %v2401_v33 = vpop.f32.mrf.mxu1 }
 0x2e6   : > { %v416_v34 = vpop.xlane.xlu1 %415 }
 0x2e7   : > { %v417_v35 = vsub.f32 %v409_v23, %v416_v34 }
 0x2e9   : > { %v418_v36 = vmul.f32 1.442695, %v417_v35 }
 0x2eb   : > { %2667 = vpow2.f32 %v418_v36 }
 0x2ee   : > { %v529_v37 = vpop.xlane.xlu0 %528 }
 0x2ef   : > { %v530_v38 = vsub.f32 %v522_v29, %v529_v37 }
 0x2f1   : > { %v531_v39 = vmul.f32 1.442695, %v530_v38 }
 0x2f3   : > { %2669 = vpow2.f32 %v531_v39 }
 0x2f8   : > { %v2668_v40 = vpop.eup %2667 }
 0x2f9   : > { %v420_v41 = vsel %vm367_vm2, %v2668_v40, 0.0 }
 0x2fa   : > { %421 = vadd.xlane.f32.xlu0 %v420_v41 }
 0x300   : > { %v2670_v42 = vpop.eup %2669 }
 0x301   : > { %v533_v43 = vsel %vm367_vm2, %v2670_v42, 0.0 }
 0x302   : > { %534 = vadd.xlane.f32.xlu1 %v533_v43  ;;  %v792_v43 = vld [vmem:[%s3423_s3 + $0x8] sm:$0xf] }
 0x310   : > { %426 = vrot.lane.b32.xlu0 %v3052_v9, %s2854_s8 }
 0x313   : > { %539 = vrot.lane.b32.xlu1 %v3052_v9, %s2855_s14 }
 0x314   : > { %681 = vrot.lane.b32.xlu0 %v3052_v9, %s2856_s25 }
 0x317   : > { %683 = vrot.lane.b32.xlu1 %v3052_v9, %s2857_s13 }
 0x383   : > { %v422_v44 = vpop.xlane.xlu0 %421 }
 0x384   : > { %2671 = vrcp.f32 %v422_v44  ;;  %v797_v44 = vsel %vm431_vm4, %v792_v43, 0 }
 0x387   : > { %v427_v45 = vpop.permute.xlu0 %426 }
 0x388   : > { %v433_v46 = vsel %vm431_vm4, %v427_v45, 0 }
 0x389   : > { %2391 = vmatpush3.bf16.msra.mxu0 %v433_v46 }
 0x38a   : > { %2402 = vmatprep.subr.bf16.mxu0 %v2848_v0 }
 0x38b   : > { %v535_v47 = vpop.xlane.xlu1 %534  ;;  %v682_v12 = vpop.permute.xlu0 %681 }
 0x38c   : > { %2673 = vrcp.f32 %v535_v47 }
 0x38f   : > { %v540_v50 = vpop.permute.xlu1 %539 }
 0x390   : > { %v545_v52 = vsel %vm431_vm4, %v540_v50, 0 }
 0x391   : > { %v2672_v48 = vpop.eup %2671 }
 0x392   : > { %v424_v49 = vmul.f32 %v2672_v48, %v2668_v40 }
 0x393   : > { %v684_v2 = vpop.permute.xlu1 %683 }
 0x394   : > { %v425_v51 = vpack.c.bf16 %v424_v49, %v424_v49  ;;  %v689_v8 = vsel %vm367_vm2, %v684_v2, 0 }
 0x396   : > { %2393 = vmatmul.mubr.msk.bf16.vlgmr.msra.gmra.mxu0 %vm367_vm2, %v425_v51 }
 0x397   : > { %2403 = vmatpush3.bf16.msra.mxu0 %v545_v52  ;;  %2404 = vmatprep.mubr.msk.bf16.mxu0 %vm2849_vm0, %v2848_v0 }
 0x398   : > { %2414 = vmatprep.subr.bf16.mxu0 %v2848_v0 }
 0x399   : > { %v2674_v53 = vpop.eup %2673 }
 0x39a   : > { %v537_v54 = vmul.f32 %v2674_v53, %v2670_v42 }
 0x39c   : > { %v538_v55 = vpack.c.bf16 %v537_v54, %v537_v54 }
 0x39e   : > { %2405 = vmatmul.mubr.msk.bf16.vlgmr.msra.gmra.mxu0 %vm367_vm2, %v538_v55 }
 0x39f   : > { %2416 = vmatprep.mubr.msk.bf16.mxu0 %vm2849_vm0, %v2848_v0  ;;  %2415 = vmatpush3.bf16.msra.mxu0 %v639_v57 }
 0x3a0   : > { %2426 = vmatprep.subr.bf16.mxu0 %v2848_v0 }
 0x456   : > { %v469_v60 = vpop.f32.mrf.mxu0 }
 0x457   : > { %v475_v61 = vpack.c.bf16 %v469_v60, %v469_v60 }
 0x458   : > { %v2394_v62 = vpop.f32.mrf.mxu0 }
 0x459   : > { %2417 = vmatmul.mubr.msk.bf16.vlgmr.msra.gmra.mxu0 %vm367_vm2, %v475_v61 }
 0x45a   : > { %v472_v63 = vpop.f32.mrf.mxu0  ;;  %2428 = vmatprep.mubr.msk.bf16.mxu0 %vm2849_vm0, %v2848_v0 }
 0x45c   : > { %v2395_v1 = vpop.f32.mrf.mxu0 }
 0x45e   : > { %v581_v4 = vpop.f32.mrf.mxu0 }
 0x45f   : > { %v587_v6 = vpack.c.bf16 %v581_v4, %v581_v4 }
 0x460   : > { %v2406_v7 = vpop.f32.mrf.mxu0 }
 0x461   : > { %2411 = vmatmul.mubr.msk.bf16.vlgmr.msra.gmra.mxu1 %vm367_vm2, %v587_v6 }
 0x462   : > { %2421 = vmatpush3.bf16.xpose.msra.mxu1 %v689_v8  ;;  %v584_v10 = vpop.f32.mrf.mxu0  ;;  %2422 = vmatprep.mubr.msk.bf16.mxu1 %vm2849_vm0, %v2848_v0 }
 0x463   : > { %2432 = vmatprep.subr.bf16.mxu1 %v2848_v0 }
 0x464   : > { %v2407_v11 = vpop.f32.mrf.mxu0 }
 0x469   : > { %2423 = vmatmul.mubr.msk.bf16.vlgmr.msra.gmra.mxu1 %vm367_vm2, %v682_v12 }
 0x46a   : > { %2434 = vmatprep.mubr.msk.bf16.mxu1 %vm2849_vm0, %v2848_v0  ;;  %2433 = vmatpush3.bf16.msra.mxu1 %v797_v44 }
 0x46b   : > { %2444 = vmatprep.subr.bf16.mxu1 %v2848_v0 }
 0x519   : > { %v675_v13 = vpop.f32.mrf.mxu0 }
 0x51b   : > { %v2418_v14 = vpop.f32.mrf.mxu0 }
 0x51d   : > { %v678_v15 = vpop.f32.mrf.mxu0 }
 0x51f   : > { %v2419_v16 = vpop.f32.mrf.mxu0 }
 0x521   : > { %v629_v17 = vpop.f32.mrf.mxu1 }
 0x522   : > { %v3119_v18 = vadd.f32 %v675_v13, %v629_v17 }
 0x523   : > { %v2412_v19 = vpop.f32.mrf.mxu1 }
 0x525   : > { %v632_v20 = vpop.f32.mrf.mxu1 }
 0x527   : > { %v2413_v22 = vpop.f32.mrf.mxu1 }
 0x529   : > { %v725_v23 = vpop.f32.mrf.mxu1 }
 0x52a   : > { %v726_v24 = vadd.f32 %v725_v23, %v3072_v21 }
 0x52b   : > { %v2424_v25 = vpop.f32.mrf.mxu1 }
 0x52c   : > { %v731_v26 = vsel %vm367_vm2, %v726_v24, -inf }
 0x52d   : > { %732 = vmax.xlane.f32.xlu1 %v731_v26  ;;  %v728_v27 = vpop.f32.mrf.mxu1 }
 0x52e   : > { %v3171_v27 = vld [vmem:[#allocation7 + $0x1] ss:$0 sm:$0xff] }
 0x52f   : > { %v2425_v28 = vpop.f32.mrf.mxu1 }
 0x53e   : > { %842 = vrot.lane.b32.xlu1 %v3052_v9, %s2858_s18 }
 0x542   : > { %840 = vrot.lane.b32.xlu1 %v3052_v9, %s3435_s16 }
 0x5b6   : > { %v733_v29 = vpop.xlane.xlu1 %732 }
 0x5b7   : > { %v734_v30 = vsub.f32 %v726_v24, %v733_v29 }
 0x5b9   : > { %v735_v31 = vmul.f32 1.442695, %v734_v30 }
 0x5ba   : > { %v843_v39 = vpop.permute.xlu1 %842 }
 0x5bb   : > { %2675 = vpow2.f32 %v735_v31  ;;  %v848_v41 = vsel %vm367_vm2, %v843_v39, 0 }
 0x5be   : > { %v841_v42 = vpop.permute.xlu1 %840 }
 0x5c8   : > { %v2676_v32 = vpop.eup %2675 }
 0x5c9   : > { %v737_v33 = vsel %vm367_vm2, %v2676_v32, 0.0 }
 0x5ca   : > { %738 = vadd.xlane.f32.xlu0 %v737_v33  ;;  %v2654_v33 = vld [vmem:[%s3424_s4] sm:$0xff]  }
 0x5e0   : > { %743 = vrot.lane.b32.xlu0 %v3052_v9, %s3434_s12  ;;  %s3450_s12 = smov 48  }
 0x653   : > { %v739_v34 = vpop.xlane.xlu0 %738 }
 0x654   : > { %2677 = vrcp.f32 %v739_v34  ;;  %v2655_v34 = vld [vmem:[%s3425_s5 + $0x18] sm:$0xff]  }
 0x657   : > { %v744_v35 = vpop.permute.xlu0 %743 }
 0x658   : > { %v749_v36 = vsel %vm431_vm4, %v744_v35, 0  ;;  %v2246_v35 = vld [vmem:[#allocation7 + $0x2] ss:$0 sm:$0xff] }
 0x659   : > { %2427 = vmatpush3.bf16.msra.mxu0 %v749_v36  ;;  %v2656_v36 = vld [vmem:[%s3425_s5 + $0x10] sm:$0xff]  }
 0x65a   : > { %2438 = vmatprep.subr.bf16.mxu0 %v2848_v0 }
 0x661   : > { %v2678_v37 = vpop.eup %2677 }
 0x662   : > { %v741_v38 = vmul.f32 %v2678_v37, %v2676_v32 }
 0x664   : > { %v742_v40 = vpack.c.bf16 %v741_v38, %v741_v38 }
 0x666   : > { %2429 = vmatmul.mubr.msk.bf16.vlgmr.msra.gmra.mxu0 %vm367_vm2, %v742_v40 }
 0x667   : > { %2439 = vmatpush3.bf16.xpose.msra.mxu0 %v848_v41  ;;  %2440 = vmatprep.mubr.msk.bf16.mxu0 %vm2849_vm0, %v2848_v0 }
 0x668   : > { %2450 = vmatprep.subr.bf16.mxu0 %v2848_v0 }
 0x66e   : > { %2441 = vmatmul.mubr.msk.bf16.vlgmr.msra.gmra.mxu0 %vm367_vm2, %v841_v42 }
 0x66f   : > { %2452 = vmatprep.mubr.msk.bf16.mxu0 %vm2849_vm0, %v2848_v0 }
 0x726   : > { %v785_v45 = vpop.f32.mrf.mxu0 }
 0x727   : > { %v791_v46 = vpack.c.bf16 %v785_v45, %v785_v45 }
 0x728   : > { %v2430_v47 = vpop.f32.mrf.mxu0 }
 0x729   : > { %2435 = vmatmul.mubr.msk.bf16.vlgmr.msra.gmra.mxu1 %vm367_vm2, %v791_v46  ;;  %v2657_v46 = vld [vmem:[%s3425_s5 + $0x8] sm:$0xff]   ;;  %v2658_v47 = vld [vmem:[%s3425_s5] sm:$0xff]  }
 0x72a   : > { %v788_v48 = vpop.f32.mrf.mxu0  ;;  %2446 = vmatprep.mubr.msk.bf16.mxu1 %vm2849_vm0, %v2848_v0 }
 0x72c   : > { %v2431_v49 = vpop.f32.mrf.mxu0 }
 0x72e   : > { %v884_v50 = vpop.f32.mrf.mxu0 }
 0x72f   : > { %v885_v51 = vadd.f32 %v884_v50, %v3072_v21 }
 0x730   : > { %v2442_v52 = vpop.f32.mrf.mxu0 }
 0x731   : > { %v890_v53 = vsel %vm367_vm2, %v885_v51, -inf }
 0x732   : > { %891 = vmax.xlane.f32.xlu0 %v890_v53  ;;  %v887_v54 = vpop.f32.mrf.mxu0 }
 0x734   : > { %v2443_v55 = vpop.f32.mrf.mxu0 }
 0x748   : > { %902 = vrot.lane.b32.xlu0 %v3052_v9, %s3433_s9  ;;  %v951_v9 = vld [vmem:[%s3423_s3 + $0xc] sm:$0xf] }
 0x749   : > { %v956_v4 = vsel %vm431_vm4, %v951_v9, 0 }
 0x74a   : > { %2451 = vmatpush3.bf16.msra.mxu0 %v956_v4 }
 0x74b   : > { %2464 = vmatprep.subr.bf16.mxu0 %v2848_v0 }
 0x7bb   : > { %v892_v56 = vpop.xlane.xlu0 %891 }
 0x7bc   : > { %v893_v57 = vsub.f32 %v885_v51, %v892_v56 }
 0x7be   : > { %v894_v58 = vmul.f32 1.442695, %v893_v57 }
 0x7bf   : > { %v903_v59 = vpop.permute.xlu0 %902 }
 0x7c0   : > { %2679 = vpow2.f32 %v894_v58  ;;  %v908_v60 = vsel %vm431_vm4, %v903_v59, 0 }
 0x7c1   : > { %2445 = vmatpush3.bf16.msra.mxu1 %v908_v60 }
 0x7c2   : > { %2456 = vmatprep.subr.bf16.mxu1 %v2848_v0 }
 0x7cd   : > { %v2680_v61 = vpop.eup %2679 }
 0x7ce   : > { %v896_v62 = vsel %vm367_vm2, %v2680_v61, 0.0 }
 0x7cf   : > { %897 = vadd.xlane.f32.xlu1 %v896_v62 }
 0x7e0   : > { %1000 = vrot.lane.b32.xlu1 %v3049_v5, %s2862_s6 }
 0x7e9   : > { %v833_v63 = vpop.f32.mrf.mxu1 }
 0x7ea   : > { %v839_v1 = vadd.f32 %v833_v63, %v3119_v18 }
 0x7eb   : > { %v2436_v2 = vpop.f32.mrf.mxu1 }
 0x7ed   : > { %v836_v6 = vpop.f32.mrf.mxu1 }
 0x7ee   : > { %v2659_v6 = vld [vmem:[%s3422_s2 + $0x18] sm:$0xff]  }
 0x7ef   : > { %v2437_v7 = vpop.f32.mrf.mxu1 }
 0x7f0   : > { %v2660_v7 = vld [vmem:[%s3422_s2 + $0x10] sm:$0xff]  }
 0x858   : > { %v898_v8 = vpop.xlane.xlu1 %897 }
 0x859   : > { %2681 = vrcp.f32 %v898_v8 }
 0x85c   : > { %v1001_v19 = vpop.permute.xlu1 %1000 }
 0x866   : > { %v2682_v10 = vpop.eup %2681 }
 0x867   : > { %v900_v11 = vmul.f32 %v2682_v10, %v2680_v61 }
 0x869   : > { %v901_v12 = vpack.c.bf16 %v900_v11, %v900_v11 }
 0x86b   : > { %2447 = vmatmul.mubr.msk.bf16.vlgmr.msra.gmra.mxu1 %vm367_vm2, %v901_v12 }
 0x86c   : > { %2460 = vmatprep.mubr.msk.bf16.mxu1 %vm2849_vm0, %v2848_v0 }
 0x92b   : > { %v944_v13 = vpop.f32.mrf.mxu1 }
 0x92c   : > { %v950_v14 = vpack.c.bf16 %v944_v13, %v944_v13 }
 0x92d   : > { %v2448_v15 = vpop.f32.mrf.mxu1 }
 0x92e   : > { %2453 = vmatmul.mubr.msk.bf16.vlgmr.msra.gmra.mxu0 %vm367_vm2, %v950_v14 }
 0x92f   : > { %v947_v16 = vpop.f32.mrf.mxu1  ;;  %2472 = vmatprep.mubr.msk.bf16.mxu0 %vm2849_vm0, %v2848_v0  ;;  %2465 = vmatpush3.bf16.msra.mxu0 %v2655_v34 }
 0x930   : > { %2466 = vmatprep.subr.bf16.mxu0 %v2848_v0 }
 0x931   : > { %v2449_v17 = vpop.f32.mrf.mxu1 }
 0x933   : > { %2467 = vmatpush3.bf16.msra.mxu0 %v2656_v36 }
 0x934   : > { %2468 = vmatprep.subr.bf16.mxu0 %v2848_v0 }
 0x937   : > { %2469 = vmatpush3.bf16.msra.mxu0 %v2657_v46 }
 0x938   : > { %2470 = vmatprep.subr.bf16.mxu0 %v2848_v0 }
 0x93b   : > { %2471 = vmatpush3.bf16.msra.mxu0 %v2658_v47 }
 0x93c   : > { %2490 = vmatprep.subr.bf16.mxu0 %v2848_v0 }
 0x9ee   : > { %v992_v18 = vpop.f32.mrf.mxu0 }
 0x9ef   : > { %v998_v20 = vadd.f32 %v992_v18, %v839_v1 }
 0x9f0   : > { %v2454_v22 = vpop.f32.mrf.mxu0 }
 0x9f1   : > { %v1003_v23 = vadd.f32 %v1001_v19, %v998_v20  ;;  %v3229_v19 = vld [vmem:[#allocation7 + $0x8] ss:$0 sm:$0xff] }
 0x9f2   : > { %v995_v24 = vpop.f32.mrf.mxu0 }
 0x9f3   : > { %v1004_v25 = vadd.f32 %v1003_v23, %v3040_v3  ;;  %v2653_v3 = vld [vmem:[%s3424_s4 + $0x8] sm:$0xff]  }
 0x9f4   : > { %v2455_v26 = vpop.f32.mrf.mxu0  ;;  %2457 = vmatpush3.bf16.msra.mxu1 %v2653_v3 }
 0x9f5   : > { %v1005_v5 = vsel %vm319_vm1, %v1004_v25, 0.0  ;;  %2458 = vmatprep.subr.bf16.mxu1 %v2848_v0 }
 0x9f6   : > { %1006 = vadd.xlane.f32.xlu0 %v1005_v5 }
 0x9f8   : > { %2459 = vmatpush3.bf16.msra.mxu1 %v2654_v33 }
 0x9f9   : > { %2476 = vmatprep.subr.bf16.mxu1 %v2848_v0 }
 0xa0c   : > { %1025 = vrot.lane.b32.xlu0 %v3171_v27, %s2851_s19 }
 0xa7f   : > { %v1007_v28 = vpop.xlane.xlu0 %1006 }
 0xa80   : > { %v1009_v29 = vmul.f32 0.03125, %v1007_v28 }
 0xa82   : > { %v1010_v30 = vsub.f32 %v1004_v25, %v1009_v29 }
 0xa83   : > { %v1026_v42 = vpop.permute.xlu0 %1025 }
 0xa84   : > { %v1011_v31 = vmul.f32 %v1010_v30, %v1010_v30 }
 0xa86   : > { %v1012_v32 = vsel %vm319_vm1, %v1011_v31, 0.0 }
 0xa87   : > { %1013 = vadd.xlane.f32.xlu1 %v1012_v32 }
 0xa98   : > { %1128 = vrot.lane.b32.xlu1 %v2246_v35, %s2854_s8 }
 0xb10   : > { %v1014_v37 = vpop.xlane.xlu1 %1013 }
 0xb11   : > { %v1015_v38 = vmul.f32 0.03125, %v1014_v37 }
 0xb13   : > { %v1016_v39 = vadd.f32 1e-06, %v1015_v38 }
 0xb14   : > { %v1129_v55 = vpop.permute.xlu1 %1128 }
 0xb15   : > { %2683 = vrsqrt.f32 %v1016_v39 }
 0xb22   : > { %v2684_v40 = vpop.eup %2683 }
 0xb23   : > { %v1018_v41 = vmul.f32 %v2684_v40, %v1010_v30 }
 0xb25   : > { %v1023_v43 = vmul.f32 %v3171_v27, %v1018_v41 }
 0xb27   : > { %v1028_v44 = vadd.f32 %v1026_v42, %v1023_v43 }
 0xb29   : > { %v1029_v45 = vpack.c.bf16 %v1028_v44, %v1028_v44 }
 0xb2b   : > { %2461 = vmatmul.mubr.msk.bf16.vlgmr.msra.gmra.mxu1 %vm319_vm1, %v1029_v45 }
 0xb2c   : > { %2480 = vmatprep.mubr.msk.bf16.mxu1 %vm2849_vm0, %v2848_v0  ;;  %2477 = vmatpush3.bf16.msra.mxu1 %v2659_v6 }
 0xb2d   : > { %2478 = vmatprep.subr.bf16.mxu1 %v2848_v0 }
 0xb30   : > { %2479 = vmatpush3.bf16.msra.mxu1 %v2660_v7 }
 0xb31   : > { %2484 = vmatprep.subr.bf16.mxu1 %v2848_v0 }
 0xbeb   : > { %v1087_v48 = vpop.f32.mrf.mxu1 }
 0xbec   : > { %v1088_v49 = vadd.f32 %v2246_v35, %v1087_v48 }
 0xbed   : > { %v2462_v50 = vpop.f32.mrf.mxu1 }
 0xbee   : > { %v1093_v51 = vmax.f32 %v1088_v49, 0.0 }
 0xbef   : > { %v1090_v52 = vpop.f32.mrf.mxu1 }
 0xbf0   : > { %v1094_v53 = vpack.c.bf16 %v1093_v51, %v1093_v51 }
 0xbf1   : > { %v2463_v54 = vpop.f32.mrf.mxu1 }
 0xbf2   : > { %2473 = vmatmul.mubr.msk.bf16.vlgmr.msra.gmra.mxu0 %vm1131_vm5, %v1094_v53 }
 0xbf3   : > { %2492 = vmatprep.mubr.msk.bf16.mxu0 %vm2849_vm0, %v2848_v0 }
 0xcb2   : > { %v1169_v56 = vpop.f32.mrf.mxu0 }
 0xcb3   : > { %v1170_v57 = vadd.f32 %v1169_v56, %v1129_v55 }
 0xcb4   : > { %v2474_v58 = vpop.f32.mrf.mxu0 }
 0xcb5   : > { %v1175_v59 = vadd.f32 %v1170_v57, %v1028_v44 }
 0xcb6   : > { %v1172_v60 = vpop.f32.mrf.mxu0 }
 0xcb7   : > { %v1176_v61 = vsel %vm319_vm1, %v1175_v59, 0.0 }
 0xcb8   : > { %1177 = vadd.xlane.f32.xlu0 %v1176_v61  ;;  %v2475_v62 = vpop.f32.mrf.mxu0 }
 0xcce   : > { %1189 = vrot.lane.b32.xlu0 %v3171_v27, %s2854_s8 }
 0xd41   : > { %v1178_v63 = vpop.xlane.xlu0 %1177 }
 0xd42   : > { %v1179_v1 = vmul.f32 0.03125, %v1178_v63 }
 0xd44   : > { %v1180_v2 = vsub.f32 %v1175_v59, %v1179_v1  ;;  %v2265_v1 = vld [vmem:[%s3423_s3 + $0x10] sm:$0xf] }
 0xd45   : > { %v1190_v13 = vpop.permute.xlu0 %1189 }
 0xd46   : > { %v1181_v9 = vmul.f32 %v1180_v2, %v1180_v2 }
 0xd48   : > { %v1182_v4 = vsel %vm319_vm1, %v1181_v9, 0.0  ;;  %v2268_v9 = vld [vmem:[%s3423_s3 + $0x14] sm:$0xf] }
 0xd49   : > { %1183 = vadd.xlane.f32.xlu1 %v1182_v4  ;;  %v1495_v4 = vsel %vm431_vm4, %v2268_v9, 0 }
 0xd5a   : > { %1193 = vrot.lane.b32.xlu1 %v3171_v27, %s2862_s6 }
 0xdd2   : > { %v1184_v8 = vpop.xlane.xlu1 %1183 }
 0xdd3   : > { %v1185_v10 = vmul.f32 0.03125, %v1184_v8 }
 0xdd5   : > { %v1186_v11 = vadd.f32 1e-06, %v1185_v10 }
 0xdd6   : > { %v1194_v15 = vpop.permute.xlu1 %1193 }
 0xdd7   : > { %2685 = vrsqrt.f32 %v1186_v11 }
 0xde4   : > { %v2686_v12 = vpop.eup %2685 }
 0xde5   : > { %v1188_v14 = vmul.f32 %v2686_v12, %v1180_v2  ;;  %v1541_v2 = vsel %vm431_vm4, %v2265_v1, 0 }
 0xde7   : > { %v1192_v16 = vmul.f32 %v1190_v13, %v1188_v14 }
 0xde9   : > { %v3222_v17 = vadd.f32 %v1194_v15, %v1192_v16 }
 0xdeb   : > { %v1201_v18 = vpack.c.bf16 %v3222_v17, %v3222_v17 }
 0xded   : > { %2481 = vmatmul.mubr.msk.bf16.vlgmr.msra.gmra.mxu1 %vm319_vm1, %v1201_v18 }
 0xdee   : > { %2486 = vmatprep.mubr.msk.bf16.mxu1 %vm2849_vm0, %v2848_v0 }
 0xead   : > { %v1260_v20 = vpop.f32.mrf.mxu1 }
 0xeae   : > { %v1261_v22 = vadd.f32 %v3229_v19, %v1260_v20 }
 0xeaf   : > { %v2482_v23 = vpop.f32.mrf.mxu1 }
 0xeb0   : > { %v3232_v24 = vpack.c.bf16 %v1261_v22, %v1261_v22 }
 0xeb1   : > { %v1263_v25 = vpop.f32.mrf.mxu1 }
 0xeb2   : > { %1381 = vrot.lane.b32.xlu1 %v3232_v24, %s2852_s26  ;;  %1268 = vrot.lane.b32.xlu0 %v3232_v24, %s2851_s19 }
 0xeb3   : > { %v2483_v26 = vpop.f32.mrf.mxu1 }
 0xeb6   : > { %1379 = vrot.lane.b32.xlu0 %v3232_v24, %s2850_s17 }
 0xf24   : > { %v1269_v5 = vpop.permute.xlu0 %1268  ;;  %v1382_v28 = vpop.permute.xlu1 %1381 }
 0xf25   : > { %v1274_v27 = vsel %vm367_vm2, %v1269_v5, 0  ;;  %v1387_v29 = vsel %vm367_vm2, %v1382_v28, 0 }
 0xf26   : > { %2485 = vmatpush3.bf16.xpose.msra.mxu1 %v1274_v27 }
 0xf27   : > { %2496 = vmatprep.subr.bf16.mxu1 %v2848_v0 }
 0xf28   : > { %v1380_v30 = vpop.permute.xlu0 %1379 }
 0xf2d   : > { %2487 = vmatmul.mubr.msk.bf16.vlgmr.msra.gmra.mxu1 %vm367_vm2, %v3232_v24 }
 0xf2e   : > { %2497 = vmatpush3.bf16.xpose.msra.mxu1 %v1387_v29  ;;  %2498 = vmatprep.mubr.msk.bf16.mxu1 %vm2849_vm0, %v2848_v0 }
 0xf2f   : > { %2508 = vmatprep.subr.bf16.mxu1 %v2848_v0 }
 0xf35   : > { %2499 = vmatmul.mubr.msk.bf16.vlgmr.msra.gmra.mxu1 %vm367_vm2, %v1380_v30 }
 0xf36   : > { %2510 = vmatprep.mubr.msk.bf16.mxu1 %vm2849_vm0, %v2848_v0  ;;  %2509 = vmatpush3.bf16.msra.mxu1 %v1495_v4 }
 0xf37   : > { %2520 = vmatprep.subr.bf16.mxu1 %v2848_v0 }
 0xfed   : > { %v1310_v31 = vpop.f32.mrf.mxu1 }
 0xfee   : > { %v1311_v32 = vadd.f32 %v1310_v31, %v3072_v21 }
 0xfef   : > { %v2488_v3 = vpop.f32.mrf.mxu1 }
 0xff0   : > { %v1316_v33 = vsel %vm367_vm2, %v1311_v32, -inf }
 0xff1   : > { %1317 = vmax.xlane.f32.xlu1 %v1316_v33  ;;  %v1313_v34 = vpop.f32.mrf.mxu1 }
 0xff3   : > { %v2489_v35 = vpop.f32.mrf.mxu1 }
 0xff5   : > { %v1423_v36 = vpop.f32.mrf.mxu1 }
 0xff6   : > { %v1424_v37 = vadd.f32 %v1423_v36, %v3072_v21 }
 0xff7   : > { %v2500_v38 = vpop.f32.mrf.mxu1 }
 0xff8   : > { %v1429_v39 = vsel %vm367_vm2, %v1424_v37, -inf }
 0xff9   : > { %1430 = vmax.xlane.f32.xlu0 %v1429_v39  ;;  %v1426_v40 = vpop.f32.mrf.mxu1 }
 0xffb   : > { %v2501_v41 = vpop.f32.mrf.mxu1 }
0x107a   : > { %v1318_v42 = vpop.xlane.xlu1 %1317 }
0x107b   : > { %v1319_v43 = vsub.f32 %v1311_v32, %v1318_v42 }
0x107d   : > { %v1320_v44 = vmul.f32 1.442695, %v1319_v43 }
0x107f   : > { %2687 = vpow2.f32 %v1320_v44 }
0x1082   : > { %v1431_v45 = vpop.xlane.xlu0 %1430 }
0x1083   : > { %v1432_v46 = vsub.f32 %v1424_v37, %v1431_v45 }
0x1085   : > { %v1433_v47 = vmul.f32 1.442695, %v1432_v46 }
0x1087   : > { %2689 = vpow2.f32 %v1433_v47 }
0x108c   : > { %v2688_v48 = vpop.eup %2687 }
0x108d   : > { %v1322_v49 = vsel %vm367_vm2, %v2688_v48, 0.0 }
0x108e   : > { %1323 = vadd.xlane.f32.xlu0 %v1322_v49 }
0x1094   : > { %v2690_v50 = vpop.eup %2689 }
0x1095   : > { %v1435_v51 = vsel %vm367_vm2, %v2690_v50, 0.0 }
0x1096   : > { %1436 = vadd.xlane.f32.xlu1 %v1435_v51  ;;  %v2273_v51 = vld [vmem:[%s3423_s3 + $0x18] sm:$0xf] }
0x10a4   : > { %1328 = vrot.lane.b32.xlu0 %v3232_v24, %s2854_s8 }
0x10a7   : > { %1441 = vrot.lane.b32.xlu1 %v3232_v24, %s2855_s14 }
0x10a8   : > { %1583 = vrot.lane.b32.xlu0 %v3232_v24, %s2856_s25  ;;  %s2126_s25 = scalar_lea.sflag [#allocation6], %s3014_s20 }
0x10ab   : > { %1585 = vrot.lane.b32.xlu1 %v3232_v24, %s2857_s13  ;;  %s3449_s13 = smov 104  }
0x1117   : > { %v1324_v52 = vpop.xlane.xlu0 %1323 }
0x1118   : > { %2691 = vrcp.f32 %v1324_v52  ;;  %v1699_v52 = vsel %vm431_vm4, %v2273_v51, 0 }
0x111b   : > { %v1329_v53 = vpop.permute.xlu0 %1328 }
0x111c   : > { %v1334_v54 = vsel %vm431_vm4, %v1329_v53, 0 }
0x111d   : > { %2491 = vmatpush3.bf16.msra.mxu0 %v1334_v54 }
0x111e   : > { %2502 = vmatprep.subr.bf16.mxu0 %v2848_v0 }
0x111f   : > { %v1437_v55 = vpop.xlane.xlu1 %1436  ;;  %v1584_v22 = vpop.permute.xlu0 %1583 }
0x1120   : > { %2693 = vrcp.f32 %v1437_v55 }
0x1123   : > { %v1442_v58 = vpop.permute.xlu1 %1441 }
0x1124   : > { %v1447_v60 = vsel %vm431_vm4, %v1442_v58, 0 }
0x1125   : > { %v2692_v56 = vpop.eup %2691 }
0x1126   : > { %v1326_v57 = vmul.f32 %v2692_v56, %v2688_v48 }
0x1127   : > { %v1586_v12 = vpop.permute.xlu1 %1585 }
0x1128   : > { %v1327_v59 = vpack.c.bf16 %v1326_v57, %v1326_v57  ;;  %v1591_v16 = vsel %vm367_vm2, %v1586_v12, 0 }
0x112a   : > { %2493 = vmatmul.mubr.msk.bf16.vlgmr.msra.gmra.mxu0 %vm367_vm2, %v1327_v59 }
0x112b   : > { %2503 = vmatpush3.bf16.msra.mxu0 %v1447_v60  ;;  %2504 = vmatprep.mubr.msk.bf16.mxu0 %vm2849_vm0, %v2848_v0 }
0x112c   : > { %2514 = vmatprep.subr.bf16.mxu0 %v2848_v0 }
0x112d   : > { %v2694_v61 = vpop.eup %2693 }
0x112e   : > { %v1439_v62 = vmul.f32 %v2694_v61, %v2690_v50 }
0x1130   : > { %v1440_v63 = vpack.c.bf16 %v1439_v62, %v1439_v62 }
0x1132   : > { %2505 = vmatmul.mubr.msk.bf16.vlgmr.msra.gmra.mxu0 %vm367_vm2, %v1440_v63 }
0x1133   : > { %2516 = vmatprep.mubr.msk.bf16.mxu0 %vm2849_vm0, %v2848_v0  ;;  %2515 = vmatpush3.bf16.msra.mxu0 %v1541_v2 }
0x1134   : > { %2526 = vmatprep.subr.bf16.mxu0 %v2848_v0 }
0x11ea   : > { %v1370_v6 = vpop.f32.mrf.mxu0 }
0x11eb   : > { %v1376_v7 = vpack.c.bf16 %v1370_v6, %v1370_v6 }
0x11ec   : > { %v2494_v8 = vpop.f32.mrf.mxu0 }
0x11ed   : > { %2517 = vmatmul.mubr.msk.bf16.vlgmr.msra.gmra.mxu0 %vm367_vm2, %v1376_v7 }
0x11ee   : > { %v1373_v10 = vpop.f32.mrf.mxu0  ;;  %2528 = vmatprep.mubr.msk.bf16.mxu0 %vm2849_vm0, %v2848_v0 }
0x11f0   : > { %v2495_v11 = vpop.f32.mrf.mxu0 }
0x11f1   : > { %v2277_v11 = vld [vmem:[%s3423_s3 + $0x1c] sm:$0xf] }
0x11f2   : > { %v1483_v13 = vpop.f32.mrf.mxu0  ;;  %v1858_v12 = vsel %vm431_vm4, %v2277_v11, 0 }
0x11f3   : > { %v1489_v14 = vpack.c.bf16 %v1483_v13, %v1483_v13 }
0x11f4   : > { %v2506_v15 = vpop.f32.mrf.mxu0 }
0x11f5   : > { %2511 = vmatmul.mubr.msk.bf16.vlgmr.msra.gmra.mxu1 %vm367_vm2, %v1489_v14 }
0x11f6   : > { %2521 = vmatpush3.bf16.xpose.msra.mxu1 %v1591_v16  ;;  %v1486_v18 = vpop.f32.mrf.mxu0  ;;  %2522 = vmatprep.mubr.msk.bf16.mxu1 %vm2849_vm0, %v2848_v0 }
0x11f7   : > { %2532 = vmatprep.subr.bf16.mxu1 %v2848_v0 }
0x11f8   : > { %v2507_v20 = vpop.f32.mrf.mxu0 }
0x11fd   : > { %2523 = vmatmul.mubr.msk.bf16.vlgmr.msra.gmra.mxu1 %vm367_vm2, %v1584_v22 }
0x11fe   : > { %2534 = vmatprep.mubr.msk.bf16.mxu1 %vm2849_vm0, %v2848_v0  ;;  %2533 = vmatpush3.bf16.msra.mxu1 %v1699_v52 }
0x11ff   : > { %2544 = vmatprep.subr.bf16.mxu1 %v2848_v0 }
0x12ad   : > { %v1577_v23 = vpop.f32.mrf.mxu0 }
0x12af   : > { %v2518_v25 = vpop.f32.mrf.mxu0 }
0x12b1   : > { %v1580_v26 = vpop.f32.mrf.mxu0 }
0x12b3   : > { %v2519_v5 = vpop.f32.mrf.mxu0 }
0x12b5   : > { %v1531_v27 = vpop.f32.mrf.mxu1 }
0x12b6   : > { %v3296_v28 = vadd.f32 %v1577_v23, %v1531_v27 }
0x12b7   : > { %v2512_v29 = vpop.f32.mrf.mxu1 }
0x12b9   : > { %v1534_v30 = vpop.f32.mrf.mxu1 }
0x12bb   : > { %v2513_v31 = vpop.f32.mrf.mxu1 }
0x12bd   : > { %v1627_v32 = vpop.f32.mrf.mxu1 }
0x12be   : > { %v1628_v3 = vadd.f32 %v1627_v32, %v3072_v21 }
0x12bf   : > { %v2524_v33 = vpop.f32.mrf.mxu1 }
0x12c0   : > { %v1633_v34 = vsel %vm367_vm2, %v1628_v3, -inf }
0x12c1   : > { %1634 = vmax.xlane.f32.xlu1 %v1633_v34  ;;  %v1630_v35 = vpop.f32.mrf.mxu1  ;;  %v2279_v34 = vld [vmem:[#allocation7 + $0x9] ss:$0 sm:$0xff] }
0x12c3   : > { %v2525_v36 = vpop.f32.mrf.mxu1 }
0x12d2   : > { %1744 = vrot.lane.b32.xlu1 %v3232_v24, %s2858_s18 }
0x12d6   : > { %1742 = vrot.lane.b32.xlu1 %v3232_v24, %s3449_s13 }
0x134a   : > { %v1635_v37 = vpop.xlane.xlu1 %1634 }
0x134b   : > { %v1636_v38 = vsub.f32 %v1628_v3, %v1635_v37 }
0x134d   : > { %v1637_v39 = vmul.f32 1.442695, %v1636_v38 }
0x134e   : > { %v1745_v47 = vpop.permute.xlu1 %1744 }
0x134f   : > { %2695 = vpow2.f32 %v1637_v39  ;;  %v1750_v49 = vsel %vm367_vm2, %v1745_v47, 0 }
0x1352   : > { %v1743_v50 = vpop.permute.xlu1 %1742 }
0x135c   : > { %v2696_v40 = vpop.eup %2695 }
0x135d   : > { %v1639_v41 = vsel %vm367_vm2, %v2696_v40, 0.0 }
0x135e   : > { %1640 = vadd.xlane.f32.xlu0 %v1639_v41  ;;  %v2663_v41 = vld [vmem:[%s3425_s5 + $0x38] sm:$0xff]  }
0x1374   : > { %1645 = vrot.lane.b32.xlu0 %v3232_v24, %s3450_s12  ;;  %s2863_s12 = smov [#allocation9]  }
0x13e7   : > { %v1641_v42 = vpop.xlane.xlu0 %1640 }
0x13e8   : > { %2697 = vrcp.f32 %v1641_v42  ;;  %v2284_v42 = vld [vmem:[#allocation7 + $0xa] ss:$0 sm:$0xff] }
0x13eb   : > { %v1646_v43 = vpop.permute.xlu0 %1645 }
0x13ec   : > { %v1651_v44 = vsel %vm431_vm4, %v1646_v43, 0  ;;  %v2664_v43 = vld [vmem:[%s3425_s5 + $0x30] sm:$0xff]  }
0x13ed   : > { %2527 = vmatpush3.bf16.msra.mxu0 %v1651_v44 }
0x13ee   : > { %2538 = vmatprep.subr.bf16.mxu0 %v2848_v0 }
0x13f5   : > { %v2698_v45 = vpop.eup %2697 }
0x13f6   : > { %v1643_v46 = vmul.f32 %v2698_v45, %v2696_v40  ;;  %v2661_v40 = vld [vmem:[%s3424_s4 + $0x18] sm:$0xff]  }
0x13f8   : > { %v1644_v48 = vpack.c.bf16 %v1643_v46, %v1643_v46 }
0x13fa   : > { %2529 = vmatmul.mubr.msk.bf16.vlgmr.msra.gmra.mxu0 %vm367_vm2, %v1644_v48 }
0x13fb   : > { %2539 = vmatpush3.bf16.xpose.msra.mxu0 %v1750_v49  ;;  %2540 = vmatprep.mubr.msk.bf16.mxu0 %vm2849_vm0, %v2848_v0 }
0x13fc   : > { %2550 = vmatprep.subr.bf16.mxu0 %v2848_v0 }
0x1402   : > { %2541 = vmatmul.mubr.msk.bf16.vlgmr.msra.gmra.mxu0 %vm367_vm2, %v1743_v50 }
0x1403   : > { %2552 = vmatprep.mubr.msk.bf16.mxu0 %vm2849_vm0, %v2848_v0  ;;  %2551 = vmatpush3.bf16.msra.mxu0 %v1858_v12 }
0x1404   : > { %2564 = vmatprep.subr.bf16.mxu0 %v2848_v0 }
0x14ba   : > { %v1687_v53 = vpop.f32.mrf.mxu0 }
0x14bb   : > { %v1693_v54 = vpack.c.bf16 %v1687_v53, %v1687_v53  ;;  %v2665_v53 = vld [vmem:[%s3425_s5 + $0x28] sm:$0xff]  }
0x14bc   : > { %v2530_v55 = vpop.f32.mrf.mxu0 }
0x14bd   : > { %2535 = vmatmul.mubr.msk.bf16.vlgmr.msra.gmra.mxu1 %vm367_vm2, %v1693_v54  ;;  %v2666_v54 = vld [vmem:[%s3425_s5 + $0x20] sm:$0xff]  }
0x14be   : > { %v1690_v56 = vpop.f32.mrf.mxu0  ;;  %2546 = vmatprep.mubr.msk.bf16.mxu1 %vm2849_vm0, %v2848_v0 }
0x14c0   : > { %v2531_v57 = vpop.f32.mrf.mxu0 }
0x14c2   : > { %v1786_v58 = vpop.f32.mrf.mxu0 }
0x14c3   : > { %v1787_v59 = vadd.f32 %v1786_v58, %v3072_v21 }
0x14c4   : > { %v2542_v60 = vpop.f32.mrf.mxu0 }
0x14c5   : > { %v1792_v61 = vsel %vm367_vm2, %v1787_v59, -inf }
0x14c6   : > { %1793 = vmax.xlane.f32.xlu0 %v1792_v61  ;;  %v1789_v62 = vpop.f32.mrf.mxu0 }
0x14c8   : > { %v2543_v63 = vpop.f32.mrf.mxu0 }
0x14dc   : > { %1804 = vrot.lane.b32.xlu0 %v3232_v24, %s3451_s11 }
0x154f   : > { %v1794_v1 = vpop.xlane.xlu0 %1793 }
0x1550   : > { %v1795_v2 = vsub.f32 %v1787_v59, %v1794_v1 }
0x1552   : > { %v1796_v9 = vmul.f32 1.442695, %v1795_v2 }
0x1553   : > { %v1805_v4 = vpop.permute.xlu0 %1804 }
0x1554   : > { %2699 = vpow2.f32 %v1796_v9  ;;  %v1810_v6 = vsel %vm431_vm4, %v1805_v4, 0 }
0x1555   : > { %2545 = vmatpush3.bf16.msra.mxu1 %v1810_v6 }
0x1556   : > { %2556 = vmatprep.subr.bf16.mxu1 %v2848_v0 }
0x1561   : > { %v2700_v21 = vpop.eup %2699 }
0x1562   : > { %v1798_v7 = vsel %vm367_vm2, %v2700_v21, 0.0 }
0x1563   : > { %1799 = vadd.xlane.f32.xlu1 %v1798_v7 }
0x1574   : > { %1902 = vrot.lane.b32.xlu1 %v3229_v19, %s2862_s6 }
0x157d   : > { %v1735_v8 = vpop.f32.mrf.mxu1 }
0x157e   : > { %v1741_v24 = vadd.f32 %v1735_v8, %v3296_v28 }
0x157f   : > { %v2536_v10 = vpop.f32.mrf.mxu1 }
0x1581   : > { %v1738_v13 = vpop.f32.mrf.mxu1 }
0x1583   : > { %v2537_v14 = vpop.f32.mrf.mxu1 }
0x15ec   : > { %v1800_v15 = vpop.xlane.xlu1 %1799 }
0x15ed   : > { %2701 = vrcp.f32 %v1800_v15 }
0x15f0   : > { %v1903_v27 = vpop.permute.xlu1 %1902 }
0x15fa   : > { %v2702_v16 = vpop.eup %2701 }
0x15fb   : > { %v1802_v18 = vmul.f32 %v2702_v16, %v2700_v21 }
0x15fd   : > { %v1803_v19 = vpack.c.bf16 %v1802_v18, %v1802_v18 }
0x15ff   : > { %2547 = vmatmul.mubr.msk.bf16.vlgmr.msra.gmra.mxu1 %vm367_vm2, %v1803_v19 }
0x1600   : > { %2560 = vmatprep.mubr.msk.bf16.mxu1 %vm2849_vm0, %v2848_v0  ;;  %2557 = vmatpush3.bf16.msra.mxu1 %v2661_v40 }
0x1601   : > { %2558 = vmatprep.subr.bf16.mxu1 %v2848_v0 }
0x16bf   : > { %v1846_v20 = vpop.f32.mrf.mxu1 }
0x16c0   : > { %v1852_v22 = vpack.c.bf16 %v1846_v20, %v1846_v20 }
0x16c1   : > { %v2548_v23 = vpop.f32.mrf.mxu1 }
0x16c2   : > { %2553 = vmatmul.mubr.msk.bf16.vlgmr.msra.gmra.mxu0 %vm367_vm2, %v1852_v22  ;;  %v2301_v23 = vld [vmem:[#allocation7 + $0x10] ss:$0 sm:$0xff] }
0x16c3   : > { %v1849_v25 = vpop.f32.mrf.mxu1  ;;  %2572 = vmatprep.mubr.msk.bf16.mxu0 %vm2849_vm0, %v2848_v0  ;;  %2565 = vmatpush3.bf16.msra.mxu0 %v2663_v41 }
0x16c4   : > { %2566 = vmatprep.subr.bf16.mxu0 %v2848_v0 }
0x16c5   : > { %v2549_v26 = vpop.f32.mrf.mxu1 }
0x16c7   : > { %2567 = vmatpush3.bf16.msra.mxu0 %v2664_v43 }
0x16c8   : > { %2568 = vmatprep.subr.bf16.mxu0 %v2848_v0 }
0x16cb   : > { %2569 = vmatpush3.bf16.msra.mxu0 %v2665_v53 }
0x16cc   : > { %2570 = vmatprep.subr.bf16.mxu0 %v2848_v0 }
0x16cf   : > { %2571 = vmatpush3.bf16.msra.mxu0 %v2666_v54 }
0x1782   : > { %v1894_v5 = vpop.f32.mrf.mxu0 }
0x1783   : > { %v1900_v28 = vadd.f32 %v1894_v5, %v1741_v24 }
0x1784   : > { %v2554_v29 = vpop.f32.mrf.mxu0 }
0x1785   : > { %v1905_v30 = vadd.f32 %v1903_v27, %v1900_v28 }
0x1786   : > { %v1897_v31 = vpop.f32.mrf.mxu0 }
0x1787   : > { %v1906_v32 = vadd.f32 %v1905_v30, %v3222_v17  ;;  %v2662_v17 = vld [vmem:[%s3424_s4 + $0x10] sm:$0xff]  }
0x1788   : > { %v2555_v3 = vpop.f32.mrf.mxu0  ;;  %2559 = vmatpush3.bf16.msra.mxu1 %v2662_v17 }
0x1789   : > { %v1907_v33 = vsel %vm319_vm1, %v1906_v32, 0.0 }
0x178a   : > { %1908 = vadd.xlane.f32.xlu0 %v1907_v33 }
0x17a0   : > { %1926 = vrot.lane.b32.xlu0 %v2279_v34, %s2851_s19 }
0x1813   : > { %v1909_v35 = vpop.xlane.xlu0 %1908 }
0x1814   : > { %v1910_v36 = vmul.f32 0.03125, %v1909_v35 }
0x1816   : > { %v1911_v37 = vsub.f32 %v1906_v32, %v1910_v36 }
0x1817   : > { %v1927_v49 = vpop.permute.xlu0 %1926 }
0x1818   : > { %v1912_v38 = vmul.f32 %v1911_v37, %v1911_v37 }
0x181a   : > { %v1913_v39 = vsel %vm319_vm1, %v1912_v38, 0.0 }
0x181b   : > { %1914 = vadd.xlane.f32.xlu1 %v1913_v39 }
0x182c   : > { %2031 = vrot.lane.b32.xlu1 %v2284_v42, %s2854_s8 }
0x18a4   : > { %v1915_v44 = vpop.xlane.xlu1 %1914 }
0x18a5   : > { %v1916_v45 = vmul.f32 0.03125, %v1915_v44 }
0x18a7   : > { %v1917_v46 = vadd.f32 1e-06, %v1916_v45 }
0x18a8   : > { %v2032_v62 = vpop.permute.xlu1 %2031 }
0x18a9   : > { %2703 = vrsqrt.f32 %v1917_v46 }
0x18b6   : > { %v2704_v47 = vpop.eup %2703 }
0x18b7   : > { %v1919_v48 = vmul.f32 %v2704_v47, %v1911_v37 }
0x18b9   : > { %v1924_v50 = vmul.f32 %v2279_v34, %v1919_v48 }
0x18bb   : > { %v1929_v51 = vadd.f32 %v1927_v49, %v1924_v50 }
0x18bd   : > { %v1930_v52 = vpack.c.bf16 %v1929_v51, %v1929_v51 }
0x18bf   : > { %2561 = vmatmul.mubr.msk.bf16.vlgmr.msra.gmra.mxu1 %vm319_vm1, %v1930_v52 }
0x197f   : > { %v1989_v55 = vpop.f32.mrf.mxu1 }
0x1980   : > { %v1990_v56 = vadd.f32 %v2284_v42, %v1989_v55 }
0x1981   : > { %v2562_v57 = vpop.f32.mrf.mxu1 }
0x1982   : > { %v1995_v58 = vmax.f32 %v1990_v56, 0.0 }
0x1983   : > { %v1992_v59 = vpop.f32.mrf.mxu1 }
0x1984   : > { %v1996_v60 = vpack.c.bf16 %v1995_v58, %v1995_v58 }
0x1985   : > { %v2563_v61 = vpop.f32.mrf.mxu1 }
0x1986   : > { %2573 = vmatmul.mubr.msk.bf16.vlgmr.msra.gmra.mxu0 %vm1131_vm5, %v1996_v60 }
0x1a46   : > { %v2071_v63 = vpop.f32.mrf.mxu0 }
0x1a47   : > { %v2072_v1 = vadd.f32 %v2071_v63, %v2032_v62 }
0x1a48   : > { %v2574_v2 = vpop.f32.mrf.mxu0 }
0x1a49   : > { %v2077_v9 = vadd.f32 %v2072_v1, %v1929_v51 }
0x1a4a   : > { %v2074_v0 = vpop.f32.mrf.mxu0 }
0x1a4b   : > { %v2078_v4 = vsel %vm319_vm1, %v2077_v9, 0.0 }
0x1a4c   : > { %2079 = vadd.xlane.f32.xlu0 %v2078_v4  ;;  %v2575_v6 = vpop.f32.mrf.mxu0 }
0x1a62   : > { %2091 = vrot.lane.b32.xlu0 %v2279_v34, %s2854_s8  ;;  %s2303_s8 = sshll.u32 %s2928_s0, 7  ;;  %s2775_s0 = sshll.u32 %s2863_s12, 4  ;;  %s2776_s0 = int_to_ptr.vmem [resolvable:$false] %s2775_s0 }
0x1a63   : > { %s2137_s14 = scalar_lea.hbm %s3427_s7, %s2303_s8  ;;  %s2777_s18 = scalar_lea.vmem %s2776_s0, 256 }
0x1ad5   : > { %v2080_v21 = vpop.xlane.xlu0 %2079 }
0x1ad6   : > { %v2081_v7 = vmul.f32 0.03125, %v2080_v21 }
0x1ad8   : > { %v2082_v8 = vsub.f32 %v2077_v9, %v2081_v7 }
0x1ad9   : > { %v2092_v15 = vpop.permute.xlu0 %2091 }
0x1ada   : > { %v2083_v24 = vmul.f32 %v2082_v8, %v2082_v8 }
0x1adc   : > { %v2084_v10 = vsel %vm319_vm1, %v2083_v24, 0.0 }
0x1add   : > { %2085 = vadd.xlane.f32.xlu1 %v2084_v10 }
0x1aee   : > { %2095 = vrot.lane.b32.xlu1 %v2279_v34, %s2862_s6  ;;  %s3452_s6 = sshll.u32 %s3014_s20, 3 }
0x1aef   : > { %s286_s16 = scalar_lea.vmem [#allocation9], %s3452_s6 }
0x1b66   : > { %v2086_v11 = vpop.xlane.xlu1 %2085 }
0x1b67   : > { %v2087_v12 = vmul.f32 0.03125, %v2086_v11 }
0x1b69   : > { %v2088_v13 = vadd.f32 1e-06, %v2087_v12 }
0x1b6a   : > { %v2096_v18 = vpop.permute.xlu1 %2095 }
0x1b6b   : > { %2705 = vrsqrt.f32 %v2088_v13 }
0x1b78   : > { %v2706_v14 = vpop.eup %2705 }
0x1b79   : > { %v2090_v16 = vmul.f32 %v2706_v14, %v2082_v8 }
0x1b7b   : > { %v2094_v19 = vmul.f32 %v2092_v15, %v2090_v16 }
0x1b7d   : > { %v2098_v20 = vadd.f32 %v2096_v18, %v2094_v19 }
0x1b7f   : > { %v2101_v22 = vsel %vm319_vm1, %v2098_v20, 0.0 }
0x1b80   : > { %2102 = vadd.xlane.f32.xlu0 %v2101_v22 }
0x1b96   : > { %2120 = vrot.lane.b32.xlu0 %v2301_v23, %s2851_s19  ;;  %s2139_s19 = sshll.u32 %s286_s16, 4  ;;  %s2140_s19 = int_to_ptr.vmem [resolvable:$true] %s2139_s19 }
0x1b97   : > { %s2771_s13 = scalar_lea.vmem %s2140_s19, 128  ;;  %p2778_p10 = scmp.lt.s32.totalorder %s2140_s19, %s2776_s0 }
0x1b98   : > { %p2772_p8 = scmp.ne.s32.totalorder %s2140_s19, %s2771_s13  ;;  %p2779_p2 = scmp.lt.s32.totalorder %s2777_s18, %s2771_s13 }
0x1b9a   : > { %p2773_p11 = pnand %p2772_p8, %p3453_p3  ;;  %p2780_p13 = por %p2779_p2, %p2778_p10 }
0x1b9c   : > { %p2774_p7 = pneg %p2773_p11 }
0x1b9e   : > { %p2781_p0 = pnand %p2780_p13, %p2774_p7 }
0x1c09   : > { %v2103_v25 = vpop.xlane.xlu0 %2102 }
0x1c0a   : > { %v2104_v26 = vmul.f32 0.03125, %v2103_v25 }
0x1c0c   : > { %v2105_v5 = vsub.f32 %v2098_v20, %v2104_v26 }
0x1c0d   : > { %v2121_v33 = vpop.permute.xlu0 %2120 }
0x1c0e   : > { %v2106_v27 = vmul.f32 %v2105_v5, %v2105_v5 }
0x1c10   : > { %v2107_v28 = vsel %vm319_vm1, %v2106_v27, 0.0 }
0x1c11   : > { %2108 = vadd.xlane.f32.xlu1 %v2107_v28 }
0x1c9a   : > { %v2109_v29 = vpop.xlane.xlu1 %2108 }
0x1c9b   : > { %v2110_v30 = vmul.f32 0.03125, %v2109_v29 }
0x1c9d   : > { %v2111_v31 = vadd.f32 1e-06, %v2110_v30 }
0x1c9f   : > { %2707 = vrsqrt.f32 %v2111_v31 }
0x1cac   : > { %v2708_v32 = vpop.eup %2707 }
0x1cad   : > { %v2113_v3 = vmul.f32 %v2708_v32, %v2105_v5 }
0x1caf   : > { %v2118_v34 = vmul.f32 %v2301_v23, %v2113_v3 }
0x1cb1   : > { %v2123_v35 = vadd.f32 %v2121_v33, %v2118_v34 }
0x1cb3   : > { %2124 = vst.msk [vmem:[%s286_s16] sm:$0xff] %vm319_vm1, %v2123_v35 }
0x1cb4   : > { %2784 = shalt.err (!%p2781_p0)
}
0x1cb5   : > { %s2785_s9 = scalar_lea.hbm %s2137_s14, 128  ;;  %s2789_s22 = scalar_lea.hbm %s3427_s7, 256 }
0x1cb6   : > { %p2786_p5 = scmp.ne.s32.totalorder %s2137_s14, %s2785_s9  ;;  %p2790_p1 = scmp.lt.s32.totalorder %s2137_s14, %s3427_s7 }
0x1cb7   : > { %p2791_p4 = scmp.lt.s32.totalorder %s2789_s22, %s2785_s9 }
0x1cb8   : > { %p2787_p9 = pnand %p2786_p5, %p3453_p3 }
0x1cb9   : > { %p2792_p6 = por %p2791_p4, %p2790_p1 }
0x1cba   : > { %p2788_p12 = pneg %p2787_p9 }
0x1cbc   : > { %p2793_p8 = pnand %p2792_p6, %p2788_p12 }
0x1cbe   : > { %2796 = shalt.err (!%p2793_p8)
}
0x1cbf   : > { %2582 = dma.vmem_to_hbm [thread:$0]  (%p3453_p3), %s2140_s19, 128, %s2137_s14, %s2126_s25  }
0x1cc0 PF: > { %s2151_s6 = sand.u32 1, %s2829_s27   ;;  %p3454_p11 = scmp.ne.s32.totalorder %s3438_s10, 0 }
0x1cc1   : > { %p3455_p7 = scmp.ge.s32.totalorder %s2841_s30, 2  ;;  %s2152_s16 = scalar_lea.sflag [#allocation6], %s2151_s6 }
0x1cc3   : > { %p2593_p10 = pnand %p3455_p7, %p3454_p11 }
0x1cc5   : > { %p2594_p2 = pneg %p2593_p10 }
0x1cc7   : > { %2824 = dma.done.wait (%p2594_p2), %s2152_s16, 128  }
0x1cc8   : > { %2826 = vsyncadd (%p2594_p2), %s2152_s16, 4294967168  ;;  %p25_p13 = scmp.ge.s32.totalorder %s2961_s15, 4   ;;  %s3456_s27 = smov %s2833_s28 }
0x1cc9   : > { %s3457_s28 = smov %s2837_s29  ;;  %s3458_s29 = smov %s2978_s23 }
0x1cca   : > { %s3459_s30 = smov %s2961_s15  ;;  %27 = sbr.rel (!%p25_p13) target bundleno = 12 (0xc), region = 99 }
0x1ccf   :  { %2157 = vsyncpa [#allocation5], 1 }
0x1cd0   :  { %2159 = vsyncpa [#allocation5 + $0x1], 1 }
0x1cd1   :  { %2160 = vsyncpa [#allocation8], 1 }
0x1cd2   :  { %2161 = vsyncpa [#allocation6], 1 }
0x1cd3   :  { %2163 = vsyncpa [#allocation6 + $0x1], 1 }

</bundles_post_ra>
